<compile_context>
chip_gen: v5e
topology: v5e:2x2
jax: 0.10.0
libtpu: 0.0.40
codegen_flags: <defaults>
</compile_context>

<pallas_src>
import jax
import jax.numpy as jnp
from jax.experimental import pallas as pl
from jax.experimental.pallas import tpu as pltpu

HIDDEN = 1024
H_CHUNK = 256                 # H is reduced in 4 chunks of 256
DEFAULT_MAX_TILE = 1024       # lane-dense batch tile; safe on v5e/v6e/v7x VMEM


def _cdiv(a, b):
    return (a + b - 1) // b


def _round_up(a, m):
    return _cdiv(a, m) * m


def _choose_tile(n, max_tile):
    """Lane-dense tile width (multiple of 128, <= max_tile). For multi-step
    grids prefer an even step count so v7x's two TensorCores split evenly."""
    full = _round_up(max(n, 1), 128)
    if full <= max_tile:
        return full
    g = 2
    while _round_up(_cdiv(n, g), 128) > max_tile:
        g += 2
    return _round_up(_cdiv(n, g), 128)


def gamma_kernel(scal_ref, t_ref, w2e_ref, b2e_ref, w3h_ref, out_ref):
    # scal_ref (SMEM, f32[3]): [A, B, scale] with
    #   gamma(t) = A + B*t + scale * sum_j w3h_j * tanh(w2e_j*t + b2e_j)
    A = scal_ref[0]
    B = scal_ref[1]
    scale = scal_ref[2]

    t_row = t_ref[...]                                    # (1, tile) lane-dense batch
    acc = jnp.zeros_like(t_row)                           # (1, tile) f32

    # Static H-chunking: each (H_CHUNK, tile) activation chunk is produced and
    # immediately consumed by the MXU dot, so the big temporaries never pile up
    # in VMEM and the single vst slot (v5e/v6e) is not the binding unit.
    for c in range(HIDDEN // H_CHUNK):
        lo = c * H_CHUNK
        w2c = w2e_ref[lo:lo + H_CHUNK, :]                 # (H_CHUNK, 1)
        b2c = b2e_ref[lo:lo + H_CHUNK, :]                 # (H_CHUNK, 1)
        w3c = w3h_ref[:, lo:lo + H_CHUNK]                 # (1, H_CHUNK)
        h = jnp.tanh(w2c * t_row + b2c)                   # (H_CHUNK, tile): 1 EUP op/elem
        acc = acc + jnp.dot(w3c, h,                        # H-reduction on the MXU
                            preferred_element_type=jnp.float32)  # (1, tile)

    out_ref[...] = A + B * t_row + scale * acc            # lane-dense store


def gamma_network(t, params, *, max_tile=DEFAULT_MAX_TILE):
    """t: (N, 1) float32 -> gamma: (N, 1) float32 (matches GammaNetwork.forward)."""
    t = jnp.asarray(t, jnp.float32)
    N = t.shape[0]
    tf = t.reshape(-1)

    # ---- one-time parameter folding (tiny, outside the hot loop) ----
    w1 = jax.nn.softplus(jnp.asarray(params["w1"], jnp.float32))                 # ()
    b1 = jnp.asarray(params["b1"], jnp.float32)                                  # ()
    b3 = jnp.asarray(params["b3"], jnp.float32)                                  # ()
    g0 = jnp.asarray(params["gamma_0"], jnp.float32)                             # ()
    g1 = jnp.asarray(params["gamma_1"], jnp.float32)                             # ()
    w2h = 0.5 * jax.nn.softplus(jnp.asarray(params["w2"], jnp.float32)).reshape(-1)  # (H,)
    b2h = 0.5 * jnp.asarray(params["b2"], jnp.float32).reshape(-1)                   # (H,)
    w3h = 0.5 * jax.nn.softplus(jnp.asarray(params["w3"], jnp.float32)).reshape(-1)  # (H,)
    b3_eff = b3 + jnp.sum(w3h)

    # Fold l1 and the sigmoid affine into the l2 weights: z/2 = w2e*t + b2e.
    w2e = w2h * w1                                                               # (H,)
    b2e = w2h * b1 + b2h                                                         # (H,)

    # Hoisted batch-independent endpoints (same tanh formulation as the kernel).
    def gt(x):
        return w1 * x + b1 + b3_eff + jnp.sum(jnp.tanh(w2e * x + b2e) * w3h)

    gt0 = gt(jnp.float32(0.0))
    gt1 = gt(jnp.float32(1.0))
    scale = (g1 - g0) / (gt1 - gt0)
    offset = g0 - scale * gt0
    A = offset + scale * (b1 + b3_eff)
    B = scale * w1
    scalars = jnp.stack([A, B, scale]).astype(jnp.float32)                       # (3,)

    w2e_col = w2e.reshape(HIDDEN, 1)
    b2e_col = b2e.reshape(HIDDEN, 1)
    w3h_row = w3h.reshape(1, HIDDEN)

    # ---- lane-dense batch layout: (grid_n, tile) rows, zero-padded ----
    tile = _choose_tile(N, max_tile)
    grid_n = _cdiv(N, tile)
    n_pad = grid_n * tile
    t2d = jnp.pad(tf, (0, n_pad - N)).reshape(grid_n, tile)

    out2d = pl.pallas_call(
        gamma_kernel,
        out_shape=jax.ShapeDtypeStruct((grid_n, tile), jnp.float32),
        grid=(grid_n,),
        in_specs=[
            pl.BlockSpec(memory_space=pltpu.MemorySpace.SMEM),       # [A, B, scale]
            pl.BlockSpec((1, tile), lambda i: (i, 0)),               # t (lane-dense rows)
            pl.BlockSpec(memory_space=pltpu.MemorySpace.VMEM),       # w2e (H, 1), whole
            pl.BlockSpec(memory_space=pltpu.MemorySpace.VMEM),       # b2e (H, 1), whole
            pl.BlockSpec(memory_space=pltpu.MemorySpace.VMEM),       # w3h (1, H), whole
        ],
        out_specs=pl.BlockSpec((1, tile), lambda i: (i, 0)),
        compiler_params=pltpu.CompilerParams(
            dimension_semantics=("parallel",),   # shard batch tiles over TCs (v7x)
        ),
    )(scalars, t2d, w2e_col, b2e_col, w3h_row)

    return out2d.reshape(-1)[:N].reshape(N, 1)


def init_params(key):
    """Deterministic init mimicking PositiveLinear.reset_parameters:
    kaiming_uniform(a=sqrt(5)) -> U(-1/sqrt(fan_in), 1/sqrt(fan_in)), then -2 offset;
    bias -> U(-1/sqrt(fan_in), 1/sqrt(fan_in))."""
    k1, k2, k3, k4, k5, k6 = jax.random.split(key, 6)
    # l1: in=1, out=1
    w1 = jax.random.uniform(k1, (), jnp.float32, -1.0, 1.0) - 2.0
    b1 = jax.random.uniform(k2, (), jnp.float32, -1.0, 1.0)
    # l2: in=1, out=HIDDEN (stored transposed as (1, H))
    w2 = jax.random.uniform(k3, (1, HIDDEN), jnp.float32, -1.0, 1.0) - 2.0
    b2 = jax.random.uniform(k4, (1, HIDDEN), jnp.float32, -1.0, 1.0)
    # l3: in=HIDDEN, out=1 (stored as (1, H)); fan_in = HIDDEN
    bound3 = 1.0 / jnp.sqrt(jnp.float32(HIDDEN))
    w3 = jax.random.uniform(k5, (1, HIDDEN), jnp.float32, -bound3, bound3) - 2.0
    b3 = jax.random.uniform(k6, (), jnp.float32, -bound3, bound3)
    return {
        "w1": w1, "b1": b1,
        "w2": w2, "b2": b2,
        "w3": w3, "b3": b3,
        "gamma_0": jnp.float32(-5.0),
        "gamma_1": jnp.float32(10.0),
    }


def gamma_network_ref(t, params):
    """Pure-JAX reference matching the PyTorch forward exactly."""
    w1 = jax.nn.softplus(params["w1"])
    b1 = params["b1"]
    w2 = jax.nn.softplus(params["w2"])
    b2 = params["b2"]
    w3 = jax.nn.softplus(params["w3"])
    b3 = params["b3"]

    def gamma_tilde(x):
        l1_t = x * w1 + b1                                          # (N, 1)
        h = jax.nn.sigmoid(l1_t * w2 + b2)                          # (N, H)
        return l1_t + jnp.sum(h * w3, axis=-1, keepdims=True) + b3  # (N, 1)

    gt_t = gamma_tilde(t)
    gt_0 = gamma_tilde(jnp.zeros_like(t))
    gt_1 = gamma_tilde(jnp.ones_like(t))
    normalized = (gt_t - gt_0) / (gt_1 - gt_0)
    return params["gamma_0"] + (params["gamma_1"] - params["gamma_0"]) * normalized


if __name__ == "__main__":
    key = jax.random.PRNGKey(0)
    pkey, tkey = jax.random.split(key)
    params = init_params(pkey)

    # Small demo batch (N=8) plus a multi-tile, non-divisible batch to exercise
    # the lane-dense N-grid and the zero-padded final block.
    for n in (8, 2500):
        t = jax.random.uniform(jax.random.fold_in(tkey, n), (n, 1), jnp.float32, 0.0, 1.0)
        gamma = jax.block_until_ready(gamma_network(t, params))
        gamma_ref = gamma_network_ref(t, params)
        assert gamma.shape == (n, 1)
        # Tolerance covers the EUP tanh (sigmoid-as-tanh) vs XLA sigmoid lowering
        # difference, amplified by the hoisted (gt_1 - gt_0) normalization; MXU f32
        # accumulation order itself contributes ~1e-6 relative.
        assert jnp.allclose(gamma, gamma_ref, rtol=1e-3, atol=1e-2), (
            f"N={n} mismatch: max abs err {jnp.max(jnp.abs(gamma - gamma_ref))}"
        )
    print("KERNEL_OK")
</pallas_src>

<mosaic_0001>
module attributes {stable_mosaic.version = 11 : i64} {
  func.func @gamma_kernel(%arg0: i32, %arg1: memref<3xf32, #tpu.memory_space<smem>>, %arg2: memref<1x128xf32, #tpu.memory_space<vmem>>, %arg3: memref<1024x1xf32, #tpu.memory_space<vmem>>, %arg4: memref<1024x1xf32, #tpu.memory_space<vmem>>, %arg5: memref<1x1024xf32, #tpu.memory_space<vmem>>, %arg6: memref<1x128xf32, #tpu.memory_space<vmem>>) attributes {dimension_semantics = [#tpu.dimension_semantics<parallel>], iteration_bounds = array<i64: 1>, scalar_prefetch = 0 : i64, scratch_operands = 0 : i64, tpu.core_type = #tpu.core_type<tc>, window_params = [{transform_indices = @transform_0, window_bounds = array<i64: 3>}, {transform_indices = @transform_1, window_bounds = array<i64: 1, 128>}, {pipeline_mode = #tpu.pipeline_mode<synchronous>, transform_indices = @transform_2, window_bounds = array<i64: 1024, 1>}, {pipeline_mode = #tpu.pipeline_mode<synchronous>, transform_indices = @transform_3, window_bounds = array<i64: 1024, 1>}, {pipeline_mode = #tpu.pipeline_mode<synchronous>, transform_indices = @transform_4, window_bounds = array<i64: 1, 1024>}, {transform_indices = @transform_5, window_bounds = array<i64: 1, 128>}]} {
    %c0 = arith.constant 0 : index
    %0 = memref.load %arg1[%c0] : memref<3xf32, #tpu.memory_space<smem>>
    %c1 = arith.constant 1 : index
    %1 = memref.load %arg1[%c1] : memref<3xf32, #tpu.memory_space<smem>>
    %c2 = arith.constant 2 : index
    %2 = memref.load %arg1[%c2] : memref<3xf32, #tpu.memory_space<smem>>
    %c0_0 = arith.constant 0 : index
    %c0_1 = arith.constant 0 : index
    %3 = vector.load %arg2[%c0_0, %c0_1] : memref<1x128xf32, #tpu.memory_space<vmem>>, vector<1x128xf32>
    %cst = arith.constant 0.000000e+00 : f32
    %4 = vector.broadcast %cst : f32 to vector<1x128xf32>
    %c0_2 = arith.constant 0 : index
    %c0_3 = arith.constant 0 : index
    %5 = vector.load %arg3[%c0_2, %c0_3] : memref<1024x1xf32, #tpu.memory_space<vmem>>, vector<256x1xf32>
    %c0_4 = arith.constant 0 : index
    %c0_5 = arith.constant 0 : index
    %6 = vector.load %arg4[%c0_4, %c0_5] : memref<1024x1xf32, #tpu.memory_space<vmem>>, vector<256x1xf32>
    %c0_6 = arith.constant 0 : index
    %c0_7 = arith.constant 0 : index
    %7 = vector.load %arg5[%c0_6, %c0_7] : memref<1x1024xf32, #tpu.memory_space<vmem>>, vector<1x256xf32>
    %8 = vector.broadcast %5 : vector<256x1xf32> to vector<256x128xf32>
    %9 = vector.broadcast %3 : vector<1x128xf32> to vector<256x128xf32>
    %10 = arith.mulf %8, %9 : vector<256x128xf32>
    %11 = vector.broadcast %6 : vector<256x1xf32> to vector<256x128xf32>
    %12 = arith.addf %10, %11 : vector<256x128xf32>
    %13 = math.tanh %12 : vector<256x128xf32>
    %cst_8 = arith.constant dense<0.000000e+00> : vector<1x128xf32>
    %14 = tpu.matmul %7, %13, %cst_8 {dimension_numbers = #tpu.dot_dimension_numbers<[1], [0], [0], [1], [0, 0, 1, 1], [], []>} : vector<1x256xf32>, vector<256x128xf32>, vector<1x128xf32> -> vector<1x128xf32>
    %15 = arith.addf %4, %14 : vector<1x128xf32>
    %c256 = arith.constant 256 : index
    %c0_9 = arith.constant 0 : index
    %16 = vector.load %arg3[%c256, %c0_9] : memref<1024x1xf32, #tpu.memory_space<vmem>>, vector<256x1xf32>
    %c256_10 = arith.constant 256 : index
    %c0_11 = arith.constant 0 : index
    %17 = vector.load %arg4[%c256_10, %c0_11] : memref<1024x1xf32, #tpu.memory_space<vmem>>, vector<256x1xf32>
    %c0_12 = arith.constant 0 : index
    %c256_13 = arith.constant 256 : index
    %18 = vector.load %arg5[%c0_12, %c256_13] : memref<1x1024xf32, #tpu.memory_space<vmem>>, vector<1x256xf32>
    %19 = vector.broadcast %16 : vector<256x1xf32> to vector<256x128xf32>
    %20 = vector.broadcast %3 : vector<1x128xf32> to vector<256x128xf32>
    %21 = arith.mulf %19, %20 : vector<256x128xf32>
    %22 = vector.broadcast %17 : vector<256x1xf32> to vector<256x128xf32>
    %23 = arith.addf %21, %22 : vector<256x128xf32>
    %24 = math.tanh %23 : vector<256x128xf32>
    %cst_14 = arith.constant dense<0.000000e+00> : vector<1x128xf32>
    %25 = tpu.matmul %18, %24, %cst_14 {dimension_numbers = #tpu.dot_dimension_numbers<[1], [0], [0], [1], [0, 0, 1, 1], [], []>} : vector<1x256xf32>, vector<256x128xf32>, vector<1x128xf32> -> vector<1x128xf32>
    %26 = arith.addf %15, %25 : vector<1x128xf32>
    %c512 = arith.constant 512 : index
    %c0_15 = arith.constant 0 : index
    %27 = vector.load %arg3[%c512, %c0_15] : memref<1024x1xf32, #tpu.memory_space<vmem>>, vector<256x1xf32>
    %c512_16 = arith.constant 512 : index
    %c0_17 = arith.constant 0 : index
    %28 = vector.load %arg4[%c512_16, %c0_17] : memref<1024x1xf32, #tpu.memory_space<vmem>>, vector<256x1xf32>
    %c0_18 = arith.constant 0 : index
    %c512_19 = arith.constant 512 : index
    %29 = vector.load %arg5[%c0_18, %c512_19] : memref<1x1024xf32, #tpu.memory_space<vmem>>, vector<1x256xf32>
    %30 = vector.broadcast %27 : vector<256x1xf32> to vector<256x128xf32>
    %31 = vector.broadcast %3 : vector<1x128xf32> to vector<256x128xf32>
    %32 = arith.mulf %30, %31 : vector<256x128xf32>
    %33 = vector.broadcast %28 : vector<256x1xf32> to vector<256x128xf32>
    %34 = arith.addf %32, %33 : vector<256x128xf32>
    %35 = math.tanh %34 : vector<256x128xf32>
    %cst_20 = arith.constant dense<0.000000e+00> : vector<1x128xf32>
    %36 = tpu.matmul %29, %35, %cst_20 {dimension_numbers = #tpu.dot_dimension_numbers<[1], [0], [0], [1], [0, 0, 1, 1], [], []>} : vector<1x256xf32>, vector<256x128xf32>, vector<1x128xf32> -> vector<1x128xf32>
    %37 = arith.addf %26, %36 : vector<1x128xf32>
    %c768 = arith.constant 768 : index
    %c0_21 = arith.constant 0 : index
    %38 = vector.load %arg3[%c768, %c0_21] : memref<1024x1xf32, #tpu.memory_space<vmem>>, vector<256x1xf32>
    %c768_22 = arith.constant 768 : index
    %c0_23 = arith.constant 0 : index
    %39 = vector.load %arg4[%c768_22, %c0_23] : memref<1024x1xf32, #tpu.memory_space<vmem>>, vector<256x1xf32>
    %c0_24 = arith.constant 0 : index
    %c768_25 = arith.constant 768 : index
    %40 = vector.load %arg5[%c0_24, %c768_25] : memref<1x1024xf32, #tpu.memory_space<vmem>>, vector<1x256xf32>
    %41 = vector.broadcast %38 : vector<256x1xf32> to vector<256x128xf32>
    %42 = vector.broadcast %3 : vector<1x128xf32> to vector<256x128xf32>
    %43 = arith.mulf %41, %42 : vector<256x128xf32>
    %44 = vector.broadcast %39 : vector<256x1xf32> to vector<256x128xf32>
    %45 = arith.addf %43, %44 : vector<256x128xf32>
    %46 = math.tanh %45 : vector<256x128xf32>
    %cst_26 = arith.constant dense<0.000000e+00> : vector<1x128xf32>
    %47 = tpu.matmul %40, %46, %cst_26 {dimension_numbers = #tpu.dot_dimension_numbers<[1], [0], [0], [1], [0, 0, 1, 1], [], []>} : vector<1x256xf32>, vector<256x128xf32>, vector<1x128xf32> -> vector<1x128xf32>
    %48 = arith.addf %37, %47 : vector<1x128xf32>
    %49 = vector.broadcast %1 : f32 to vector<1x128xf32>
    %50 = arith.mulf %49, %3 : vector<1x128xf32>
    %51 = vector.broadcast %0 : f32 to vector<1x128xf32>
    %52 = arith.addf %51, %50 : vector<1x128xf32>
    %53 = vector.broadcast %2 : f32 to vector<1x128xf32>
    %54 = arith.mulf %53, %48 : vector<1x128xf32>
    %55 = arith.addf %52, %54 : vector<1x128xf32>
    %c0_27 = arith.constant 0 : index
    %c0_28 = arith.constant 0 : index
    %56 = vector.load %arg6[%c0_27, %c0_28] : memref<1x128xf32, #tpu.memory_space<vmem>>, vector<1x128xf32>
    tpu.vector_store %arg6[%c0_27, %c0_28], %55 {strides = array<i32>} : memref<1x128xf32, #tpu.memory_space<vmem>>, vector<1x128xf32>,
    return
  }
  func.func @transform_0(%arg0: i32) -> i32 {
    %c0_i32 = arith.constant 0 : i32
    %c0_i32_0 = arith.constant 0 : i32
    return %c0_i32 : i32
  }
  func.func @transform_1(%arg0: i32) -> (i32, i32) {
    %c0_i32 = arith.constant 0 : i32
    %c0_i32_0 = arith.constant 0 : i32
    return %arg0, %c0_i32 : i32, i32
  }
  func.func @transform_2(%arg0: i32) -> (i32, i32) {
    %c0_i32 = arith.constant 0 : i32
    %c0_i32_0 = arith.constant 0 : i32
    %c0_i32_1 = arith.constant 0 : i32
    return %c0_i32, %c0_i32_0 : i32, i32
  }
  func.func @transform_3(%arg0: i32) -> (i32, i32) {
    %c0_i32 = arith.constant 0 : i32
    %c0_i32_0 = arith.constant 0 : i32
    %c0_i32_1 = arith.constant 0 : i32
    return %c0_i32, %c0_i32_0 : i32, i32
  }
  func.func @transform_4(%arg0: i32) -> (i32, i32) {
    %c0_i32 = arith.constant 0 : i32
    %c0_i32_0 = arith.constant 0 : i32
    %c0_i32_1 = arith.constant 0 : i32
    return %c0_i32, %c0_i32_0 : i32, i32
  }
  func.func @transform_5(%arg0: i32) -> (i32, i32) {
    %c0_i32 = arith.constant 0 : i32
    %c0_i32_0 = arith.constant 0 : i32
    return %arg0, %c0_i32 : i32, i32
  }
}

</mosaic_0001>

<bundles_post_ra>
// kernel: tpu_custom_call.1
= control target key start
LH: loop header
LB: loop body
LE: loop exit
PB: predicated region body
PF: predicated region fallthrough
CT: control target
= control target key end

     0   :  { %10 = vsyncpa [#allocation4], 0  ;;  %s3984_s0 = inlined_call_operand.vmem [shape: f32[3], index: 0, kind: input, shape index: {}]   ;;  %s3985_s1 = inlined_call_operand.vmem [shape: f32[1,128], index: 1, kind: input, shape index: {}]   ;;  %s3986_s2 = inlined_call_operand.vmem [shape: f32[1024,1], index: 2, kind: input, shape index: {}]   ;;  %s3987_s3 = inlined_call_operand.vmem [shape: f32[1024,1], index: 3, kind: input, shape index: {}]   ;;  %s3988_s4 = inlined_call_operand.vmem [shape: f32[1,1024], index: 4, kind: input, shape index: {}]   ;;  %s3989_s5 = inlined_call_operand.hbm [shape: f32[1,128], index: 5, kind: output, shape index: {}]  }
   0x1   :  { %11 = vsyncpa [#allocation3], 0  ;;  %s17_s20 = sshll.u32 %s3984_s0, 4  ;;  %s2479_s21 = smov [#allocation2]   ;;  %s18_s20 = int_to_ptr.vmem [resolvable:$true] %s17_s20 }
   0x2   :  { %20 = dma.vmem_to_smem %s18_s20, 16, %s2479_s21, [#allocation4]  }
   0x3   :  { %2475 = dma.done.wait [#allocation4], 16  }
   0x4   :  { %2476 = vsyncadd [#allocation4], 4294967280 }
   0x5   :  { %33 = sfence }
   0x6   :  { %v42_v0 = vld [vmem:[%s3986_s2 + $0x20] sm:$0xff]  ;;  %v40_v1 = vld [vmem:[%s3986_s2 + $0x10] sm:$0xff]  ;;  %v2480_v3 = vmov 0   ;;  %v43_v4 = vld [vmem:[%s3986_s2 + $0x28] sm:$0xff]  ;;  %s2172_s24 = sld [smem:[#allocation2 + $0x1]]  ;;  %s2481_s0 = smov [#allocation5]  }
   0x7   :  { %v38_v2 = vld [vmem:[%s3986_s2] sm:$0xff]  ;;  %2179 = vset.pattern.permute.xlu2 %v2480_v3  ;;  %2178 = vset.pattern.permute.xlu1 %v2480_v3  ;;  %v41_v5 = vld [vmem:[%s3986_s2 + $0x18] sm:$0xff]  ;;  %v39_v6 = vld [vmem:[%s3986_s2 + $0x8] sm:$0xff]  ;;  %s2173_s25 = sld [smem:[#allocation2 + $0x2]]  ;;  %s2160_s28 = sshll.u32 %s2481_s0, 4  ;;  %s2161_s28 = int_to_ptr.vmem [resolvable:$true] %s2160_s28 }
   0x8   :  { %2177 = vset.pattern.permute.xlu0 %v2480_v3  ;;  %125 = vperm.xlu2 %2179, %v42_v0   ;;  %v46_v7 = vld [vmem:[%s3986_s2 + $0x40] sm:$0xff]  ;;  %v45_v8 = vld [vmem:[%s3986_s2 + $0x38] sm:$0xff]  ;;  %v44_v9 = vld [vmem:[%s3986_s2 + $0x30] sm:$0xff]  ;;  %s2162_s6 = sshll.u32 %s3989_s5, 4  ;;  %s2163_s6 = int_to_ptr.hbm [resolvable:$true] %s2162_s6 }
   0x9   :  { %115 = vperm.xlu1 %2178, %v40_v1   ;;  %105 = vperm.xlu0 %2177, %v38_v2   ;;  %v49_v10 = vld [vmem:[%s3986_s2 + $0x58] sm:$0xff]  ;;  %v48_v11 = vld [vmem:[%s3986_s2 + $0x50] sm:$0xff]  ;;  %v47_v12 = vld [vmem:[%s3986_s2 + $0x48] sm:$0xff] }
   0xa   :  { %v52_v13 = vld [vmem:[%s3986_s2 + $0x70] sm:$0xff]  ;;  %v51_v14 = vld [vmem:[%s3986_s2 + $0x68] sm:$0xff]  ;;  %v50_v15 = vld [vmem:[%s3986_s2 + $0x60] sm:$0xff] }
   0xb   :  { %v55_v16 = vld [vmem:[%s3986_s2 + $0x88] sm:$0xff]  ;;  %v54_v17 = vld [vmem:[%s3986_s2 + $0x80] sm:$0xff]  ;;  %v53_v18 = vld [vmem:[%s3986_s2 + $0x78] sm:$0xff] }
   0xc   :  { %v58_v19 = vld [vmem:[%s3986_s2 + $0xa0] sm:$0xff]  ;;  %v57_v20 = vld [vmem:[%s3986_s2 + $0x98] sm:$0xff]  ;;  %v56_v21 = vld [vmem:[%s3986_s2 + $0x90] sm:$0xff] }
   0xd   :  { %v61_v22 = vld [vmem:[%s3986_s2 + $0xb8] sm:$0xff]  ;;  %v60_v23 = vld [vmem:[%s3986_s2 + $0xb0] sm:$0xff]  ;;  %v59_v24 = vld [vmem:[%s3986_s2 + $0xa8] sm:$0xff] }
   0xe   :  { %v64_v25 = vld [vmem:[%s3986_s2 + $0xd0] sm:$0xff]  ;;  %v63_v26 = vld [vmem:[%s3986_s2 + $0xc8] sm:$0xff]  ;;  %v62_v27 = vld [vmem:[%s3986_s2 + $0xc0] sm:$0xff] }
   0xf   :  { %v67_v28 = vld [vmem:[%s3986_s2 + $0xe8] sm:$0xff]  ;;  %v66_v29 = vld [vmem:[%s3986_s2 + $0xe0] sm:$0xff]  ;;  %v65_v30 = vld [vmem:[%s3986_s2 + $0xd8] sm:$0xff] }
  0x10   :  { %130 = vperm.xlu2 %2179, %v43_v4   ;;  %v70_v31 = vld [vmem:[%s3987_s3] sm:$0xff]  ;;  %v69_v32 = vld [vmem:[%s3986_s2 + $0xf8] sm:$0xff]  ;;  %v68_v33 = vld [vmem:[%s3986_s2 + $0xf0] sm:$0xff] }
  0x11   :  { %120 = vperm.xlu1 %2178, %v41_v5   ;;  %110 = vperm.xlu0 %2177, %v39_v6   ;;  %v73_v34 = vld [vmem:[%s3987_s3 + $0x18] sm:$0xff]  ;;  %v72_v35 = vld [vmem:[%s3987_s3 + $0x10] sm:$0xff]  ;;  %v71_v36 = vld [vmem:[%s3987_s3 + $0x8] sm:$0xff] }
  0x12   :  { %v76_v38 = vld [vmem:[%s3987_s3 + $0x30] sm:$0xff]  ;;  %v75_v39 = vld [vmem:[%s3987_s3 + $0x28] sm:$0xff]  ;;  %v74_v40 = vld [vmem:[%s3987_s3 + $0x20] sm:$0xff] }
  0x13   :  { %v79_v42 = vld [vmem:[%s3987_s3 + $0x48] sm:$0xff]  ;;  %v78_v43 = vld [vmem:[%s3987_s3 + $0x40] sm:$0xff]  ;;  %v77_v44 = vld [vmem:[%s3987_s3 + $0x38] sm:$0xff] }
  0x14   :  { %v82_v46 = vld [vmem:[%s3987_s3 + $0x60] sm:$0xff]  ;;  %v81_v47 = vld [vmem:[%s3987_s3 + $0x58] sm:$0xff]  ;;  %v80_v48 = vld [vmem:[%s3987_s3 + $0x50] sm:$0xff] }
  0x15   :  { %v85_v52 = vld [vmem:[%s3987_s3 + $0x78] sm:$0xff]  ;;  %v84_v53 = vld [vmem:[%s3987_s3 + $0x70] sm:$0xff]  ;;  %v83_v54 = vld [vmem:[%s3987_s3 + $0x68] sm:$0xff] }
  0x16   :  { %v88_v58 = vld [vmem:[%s3987_s3 + $0x90] sm:$0xff]  ;;  %v87_v59 = vld [vmem:[%s3987_s3 + $0x88] sm:$0xff]  ;;  %v86_v60 = vld [vmem:[%s3987_s3 + $0x80] sm:$0xff] }
  0x17   :  { %v91_v0 = vld [vmem:[%s3987_s3 + $0xa8] sm:$0xff]  ;;  %v90_v1 = vld [vmem:[%s3987_s3 + $0xa0] sm:$0xff]  ;;  %v89_v2 = vld [vmem:[%s3987_s3 + $0x98] sm:$0xff] }
  0x18   :  { %145 = vperm.xlu2 %2179, %v46_v7   ;;  %v94_v6 = vld [vmem:[%s3987_s3 + $0xc0] sm:$0xff]  ;;  %v93_v7 = vld [vmem:[%s3987_s3 + $0xb8] sm:$0xff] }
  0x19   :  { %140 = vperm.xlu1 %2178, %v45_v8   ;;  %135 = vperm.xlu0 %2177, %v44_v9   ;;  %v92_v8 = vld [vmem:[%s3987_s3 + $0xb0] sm:$0xff] }
  0x20   :  { %160 = vperm.xlu2 %2179, %v49_v10  }
  0x21   :  { %155 = vperm.xlu1 %2178, %v48_v11   ;;  %150 = vperm.xlu0 %2177, %v47_v12   ;;  %v97_v12 = vld [vmem:[%s3987_s3 + $0xd8] sm:$0xff] }
  0x28   :  { %175 = vperm.xlu2 %2179, %v52_v13   ;;  %v96_v13 = vld [vmem:[%s3987_s3 + $0xd0] sm:$0xff] }
  0x29   :  { %170 = vperm.xlu1 %2178, %v51_v14   ;;  %165 = vperm.xlu0 %2177, %v50_v15   ;;  %v95_v14 = vld [vmem:[%s3987_s3 + $0xc8] sm:$0xff] }
  0x30   :  { %190 = vperm.xlu2 %2179, %v55_v16  }
  0x31   :  { %185 = vperm.xlu1 %2178, %v54_v17   ;;  %180 = vperm.xlu0 %2177, %v53_v18   ;;  %v100_v18 = vld [vmem:[%s3987_s3 + $0xf0] sm:$0xff] }
  0x38   :  { %205 = vperm.xlu2 %2179, %v58_v19   ;;  %v99_v19 = vld [vmem:[%s3987_s3 + $0xe8] sm:$0xff] }
  0x39   :  { %200 = vperm.xlu1 %2178, %v57_v20   ;;  %195 = vperm.xlu0 %2177, %v56_v21   ;;  %v98_v20 = vld [vmem:[%s3987_s3 + $0xe0] sm:$0xff] }
  0x40   :  { %220 = vperm.xlu2 %2179, %v61_v22  }
  0x41   :  { %215 = vperm.xlu1 %2178, %v60_v23   ;;  %210 = vperm.xlu0 %2177, %v59_v24   ;;  %v523_v24 = vld [vmem:[%s3986_s2 + $0x108] sm:$0xff] }
  0x48   :  { %235 = vperm.xlu2 %2179, %v64_v25   ;;  %v522_v25 = vld [vmem:[%s3986_s2 + $0x100] sm:$0xff] }
  0x49   :  { %230 = vperm.xlu1 %2178, %v63_v26   ;;  %225 = vperm.xlu0 %2177, %v62_v27   ;;  %v101_v26 = vld [vmem:[%s3987_s3 + $0xf8] sm:$0xff] }
  0x50   :  { %250 = vperm.xlu2 %2179, %v67_v28  }
  0x51   :  { %245 = vperm.xlu1 %2178, %v66_v29   ;;  %240 = vperm.xlu0 %2177, %v65_v30   ;;  %v526_v30 = vld [vmem:[%s3986_s2 + $0x120] sm:$0xff] }
  0x58   :  { %300 = vperm.xlu2 %2179, %v70_v31   ;;  %v525_v31 = vld [vmem:[%s3986_s2 + $0x118] sm:$0xff] }
  0x59   :  { %260 = vperm.xlu1 %2178, %v69_v32   ;;  %255 = vperm.xlu0 %2177, %v68_v33   ;;  %v524_v32 = vld [vmem:[%s3986_s2 + $0x110] sm:$0xff] }
  0x60   :  { %315 = vperm.xlu2 %2179, %v73_v34  }
  0x61   :  { %310 = vperm.xlu1 %2178, %v72_v35   ;;  %305 = vperm.xlu0 %2177, %v71_v36   ;;  %v529_v36 = vld [vmem:[%s3986_s2 + $0x138] sm:$0xff] }
  0x62   :  { %v2623_v37 = vpop.permute.xlu2 %125 }
  0x68   :  { %330 = vperm.xlu2 %2179, %v76_v38   ;;  %v528_v38 = vld [vmem:[%s3986_s2 + $0x130] sm:$0xff] }
  0x69   :  { %325 = vperm.xlu1 %2178, %v75_v39   ;;  %320 = vperm.xlu0 %2177, %v74_v40   ;;  %v527_v39 = vld [vmem:[%s3986_s2 + $0x128] sm:$0xff] }
  0x6a   :  { %v2634_v41 = vpop.permute.xlu2 %130 }
  0x70   :  { %345 = vperm.xlu2 %2179, %v79_v42  }
  0x71   :  { %340 = vperm.xlu1 %2178, %v78_v43   ;;  %335 = vperm.xlu0 %2177, %v77_v44   ;;  %v532_v44 = vld [vmem:[%s3986_s2 + $0x150] sm:$0xff] }
  0x72   :  { %v2645_v45 = vpop.permute.xlu2 %145 }
  0x78   :  { %360 = vperm.xlu2 %2179, %v82_v46   ;;  %v531_v46 = vld [vmem:[%s3986_s2 + $0x148] sm:$0xff] }
  0x79   :  { %355 = vperm.xlu1 %2178, %v81_v47   ;;  %350 = vperm.xlu0 %2177, %v80_v48   ;;  %v530_v47 = vld [vmem:[%s3986_s2 + $0x140] sm:$0xff] }
  0x7a   :  { %v2656_v49 = vpop.permute.xlu2 %160 }
  0x7b   :  { %v2658_v50 = vpop.permute.xlu1 %115  ;;  %v2660_v51 = vpop.permute.xlu0 %105 }
  0x80   :  { %375 = vperm.xlu2 %2179, %v85_v52  }
  0x81   :  { %370 = vperm.xlu1 %2178, %v84_v53   ;;  %365 = vperm.xlu0 %2177, %v83_v54   ;;  %v535_v54 = vld [vmem:[%s3986_s2 + $0x168] sm:$0xff] }
  0x82   :  { %v2671_v55 = vpop.permute.xlu2 %175 }
  0x83   :  { %v2673_v56 = vpop.permute.xlu1 %120  ;;  %v2675_v57 = vpop.permute.xlu0 %110 }
  0x88   :  { %390 = vperm.xlu2 %2179, %v88_v58   ;;  %v534_v58 = vld [vmem:[%s3986_s2 + $0x160] sm:$0xff] }
  0x89   :  { %385 = vperm.xlu1 %2178, %v87_v59   ;;  %380 = vperm.xlu0 %2177, %v86_v60   ;;  %v533_v59 = vld [vmem:[%s3986_s2 + $0x158] sm:$0xff] }
  0x8a   :  { %v2686_v61 = vpop.permute.xlu2 %190 }
  0x8b   :  { %v2688_v62 = vpop.permute.xlu1 %140  ;;  %v2690_v63 = vpop.permute.xlu0 %135 }
  0x90   :  { %405 = vperm.xlu2 %2179, %v91_v0  }
  0x91   :  { %400 = vperm.xlu1 %2178, %v90_v1   ;;  %395 = vperm.xlu0 %2177, %v89_v2   ;;  %v538_v2 = vld [vmem:[%s3986_s2 + $0x180] sm:$0xff] }
  0x92   :  { %v2701_v3 = vpop.permute.xlu2 %205 }
  0x93   :  { %v2703_v4 = vpop.permute.xlu1 %155  ;;  %v2705_v5 = vpop.permute.xlu0 %150 }
  0x98   :  { %420 = vperm.xlu2 %2179, %v94_v6   ;;  %v537_v6 = vld [vmem:[%s3986_s2 + $0x178] sm:$0xff] }
  0x99   :  { %415 = vperm.xlu1 %2178, %v93_v7   ;;  %410 = vperm.xlu0 %2177, %v92_v8   ;;  %v536_v7 = vld [vmem:[%s3986_s2 + $0x170] sm:$0xff]  ;;  %v2835_v8 = vld [vmem:[%s3985_s1] ss:$0 sm:$0xff] }
  0x9a   :  { %v2716_v9 = vpop.permute.xlu2 %220 }
  0x9b   :  { %v2718_v10 = vpop.permute.xlu1 %170  ;;  %v2720_v11 = vpop.permute.xlu0 %165 }
  0xa0   :  { %435 = vperm.xlu2 %2179, %v97_v12  }
  0xa1   :  { %430 = vperm.xlu1 %2178, %v96_v13   ;;  %425 = vperm.xlu0 %2177, %v95_v14  }
  0xa2   :  { %v2731_v15 = vpop.permute.xlu2 %235 }
  0xa3   :  { %v2733_v16 = vpop.permute.xlu1 %185  ;;  %v181_v17 = vpop.permute.xlu0 %180 }
  0xa4   :  { %v281_v12 = vmul.f32 %v2835_v8, %v181_v17  ;;  %v539_v17 = vld [vmem:[%s3986_s2 + $0x188] sm:$0xff] }
  0xa8   :  { %450 = vperm.xlu2 %2179, %v100_v18  }
  0xa9   :  { %445 = vperm.xlu1 %2178, %v99_v19   ;;  %440 = vperm.xlu0 %2177, %v98_v20   ;;  %v541_v20 = vld [vmem:[%s3986_s2 + $0x198] sm:$0xff] }
  0xaa   :  { %v2744_v21 = vpop.permute.xlu2 %250 }
  0xab   :  { %v2746_v22 = vpop.permute.xlu1 %200  ;;  %v2748_v23 = vpop.permute.xlu0 %195 }
  0xb0   :  { %594 = vperm.xlu2 %2179, %v523_v24   ;;  %v540_v24 = vld [vmem:[%s3986_s2 + $0x190] sm:$0xff] }
  0xb1   :  { %589 = vperm.xlu1 %2178, %v522_v25   ;;  %455 = vperm.xlu0 %2177, %v101_v26  }
  0xb2   :  { %v2759_v27 = vpop.permute.xlu2 %300 }
  0xb3   :  { %v2761_v28 = vpop.permute.xlu1 %215  ;;  %v2763_v29 = vpop.permute.xlu0 %210 }
  0xb8   :  { %609 = vperm.xlu2 %2179, %v526_v30  }
  0xb9   :  { %604 = vperm.xlu1 %2178, %v525_v31   ;;  %599 = vperm.xlu0 %2177, %v524_v32   ;;  %v544_v32 = vld [vmem:[%s3986_s2 + $0x1b0] sm:$0xff] }
  0xba   :  { %v2774_v33 = vpop.permute.xlu2 %315 }
  0xbb   :  { %v2776_v34 = vpop.permute.xlu1 %230  ;;  %v2778_v35 = vpop.permute.xlu0 %225 }
  0xc0   :  { %624 = vperm.xlu2 %2179, %v529_v36   ;;  %v543_v36 = vld [vmem:[%s3986_s2 + $0x1a8] sm:$0xff] }
  0xc1   :  { %619 = vperm.xlu1 %2178, %v528_v38   ;;  %614 = vperm.xlu0 %2177, %v527_v39   ;;  %v542_v38 = vld [vmem:[%s3986_s2 + $0x1a0] sm:$0xff] }
  0xc2   :  { %v2789_v40 = vpop.permute.xlu2 %330 }
  0xc3   :  { %v2791_v42 = vpop.permute.xlu1 %245  ;;  %v2793_v43 = vpop.permute.xlu0 %240 }
  0xc8   :  { %639 = vperm.xlu2 %2179, %v532_v44  }
  0xc9   :  { %634 = vperm.xlu1 %2178, %v531_v46   ;;  %629 = vperm.xlu0 %2177, %v530_v47   ;;  %v547_v47 = vld [vmem:[%s3986_s2 + $0x1c8] sm:$0xff] }
  0xca   :  { %v2804_v48 = vpop.permute.xlu2 %345 }
  0xcb   :  { %v2806_v52 = vpop.permute.xlu1 %260  ;;  %v2808_v53 = vpop.permute.xlu0 %255 }
  0xd0   :  { %654 = vperm.xlu2 %2179, %v535_v54   ;;  %v546_v54 = vld [vmem:[%s3986_s2 + $0x1c0] sm:$0xff] }
  0xd1   :  { %649 = vperm.xlu1 %2178, %v534_v58   ;;  %644 = vperm.xlu0 %2177, %v533_v59   ;;  %v545_v58 = vld [vmem:[%s3986_s2 + $0x1b8] sm:$0xff]  ;;  %v280_v59 = vmul.f32 %v2835_v8, %v2671_v55 }
  0xd2   :  { %v361_v60 = vpop.permute.xlu2 %360  ;;  %v549_v55 = vld [vmem:[%s3986_s2 + $0x1d8] sm:$0xff] }
  0xd3   :  { %v2819_v0 = vpop.permute.xlu1 %310  ;;  %v2821_v1 = vpop.permute.xlu0 %305 }
  0xd8   :  { %669 = vperm.xlu2 %2179, %v538_v2   ;;  %v279_v2 = vmul.f32 %v2835_v8, %v2718_v10  ;;  %v548_v10 = vld [vmem:[%s3986_s2 + $0x1d0] sm:$0xff] }
  0xd9   :  { %664 = vperm.xlu1 %2178, %v537_v6   ;;  %659 = vperm.xlu0 %2177, %v536_v7  }
  0xda   :  { %v376_v13 = vpop.permute.xlu2 %375 }
  0xdb   :  { %v2838_v14 = vpop.permute.xlu1 %325  ;;  %v2840_v18 = vpop.permute.xlu0 %320  ;;  %v473_v19 = vadd.f32 %v376_v13, %v281_v12 }
  0xdd   :  { %2181 = vtanh.f32 %v473_v19 }
  0xe0   :  { %684 = vperm.xlu2 %2179, %v541_v20   ;;  %v278_v20 = vmul.f32 %v2835_v8, %v2720_v11  ;;  %v276_v11 = vmul.f32 %v2835_v8, %v2703_v4 }
  0xe1   :  { %679 = vperm.xlu1 %2178, %v540_v24   ;;  %674 = vperm.xlu0 %2177, %v539_v17   ;;  %v550_v24 = vld [vmem:[%s3986_s2 + $0x1e0] sm:$0xff]  ;;  %v277_v17 = vmul.f32 %v2835_v8, %v2656_v49 }
  0xe2   :  { %v2851_v25 = vpop.permute.xlu2 %390 }
  0xe3   :  { %v2182_v26 = vpop.eup %2181  ;;  %v341_v30 = vpop.permute.xlu1 %340 }
  0xe4   :  { %v336_v31 = vpop.permute.xlu0 %335  ;;  %1053 = vmatpush.msra.mxu2 %v2182_v26  ;;  %v470_v26 = vadd.f32 %v361_v60, %v278_v20  ;;  %v274_v60 = vmul.f32 %v2835_v8, %v2645_v45  ;;  %v273_v45 = vmul.f32 %v2835_v8, %v2688_v62  ;;  %v271_v20 = vmul.f32 %v2835_v8, %v2634_v41  ;;  %v555_v41 = vld [vmem:[%s3987_s3 + $0x108] sm:$0xff] }
  0xe8   :  { %699 = vperm.xlu2 %2179, %v544_v32  }
  0xe9   :  { %694 = vperm.xlu1 %2178, %v543_v36   ;;  %689 = vperm.xlu0 %2177, %v542_v38   ;;  %v275_v38 = vmul.f32 %v2835_v8, %v2705_v5  ;;  %v552_v5 = vld [vmem:[%s3986_s2 + $0x1f0] sm:$0xff] }
  0xea   :  { %v2862_v39 = vpop.permute.xlu2 %405 }
  0xeb   :  { %v356_v44 = vpop.permute.xlu1 %355  ;;  %v467_v4 = vadd.f32 %v2804_v48, %v275_v38 }
  0xec   :  { %v351_v46 = vpop.permute.xlu0 %350  ;;  %v469_v32 = vadd.f32 %v356_v44, %v277_v17  ;;  %v553_v44 = vld [vmem:[%s3986_s2 + $0x1f8] sm:$0xff] }
  0xf0   :  { %714 = vperm.xlu2 %2179, %v547_v47   ;;  %v468_v47 = vadd.f32 %v351_v46, %v276_v11  ;;  %v551_v46 = vld [vmem:[%s3986_s2 + $0x1e8] sm:$0xff]  ;;  %v268_v11 = vmul.f32 %v2835_v8, %v2658_v50 }
  0xf1   :  { %709 = vperm.xlu1 %2178, %v546_v54   ;;  %704 = vperm.xlu0 %2177, %v545_v58  }
  0xf2   :  { %v2877_v6 = vpop.permute.xlu2 %420 }
  0xf3   :  { %v371_v7 = vpop.permute.xlu1 %370 }
  0xf4   :  { %v366_v12 = vpop.permute.xlu0 %365  ;;  %v472_v13 = vadd.f32 %v371_v7, %v280_v59  ;;  %v272_v7 = vmul.f32 %v2835_v8, %v2690_v63 }
  0xf5   :  { %v471_v19 = vadd.f32 %v366_v12, %v279_v2  ;;  %v466_v2 = vadd.f32 %v341_v30, %v274_v60  ;;  %v465_v12 = vadd.f32 %v336_v31, %v273_v45  ;;  %v270_v31 = vmul.f32 %v2835_v8, %v2623_v37 }
  0xf6   :  { %2183 = vtanh.f32 %v472_v13  ;;  %v464_v62 = vadd.f32 %v2789_v40, %v272_v7  ;;  %v554_v40 = vld [vmem:[%s3987_s3 + $0x100] sm:$0xff]  ;;  %v269_v37 = vmul.f32 %v2835_v8, %v2673_v56  ;;  %v267_v56 = vmul.f32 %v2835_v8, %v2675_v57  ;;  %v561_v7 = vld [vmem:[%s3987_s3 + $0x138] sm:$0xff] }
  0xf7   :  { %2185 = vtanh.f32 %v471_v19  ;;  %v558_v57 = vld [vmem:[%s3987_s3 + $0x120] sm:$0xff] }
  0xf8   :  { %729 = vperm.xlu2 %2179, %v550_v24   ;;  %2187 = vtanh.f32 %v470_v26 }
  0xf9   :  { %724 = vperm.xlu1 %2178, %v549_v55   ;;  %719 = vperm.xlu0 %2177, %v548_v10   ;;  %2189 = vtanh.f32 %v469_v32  ;;  %v463_v55 = vadd.f32 %v2838_v14, %v271_v20  ;;  %v556_v10 = vld [vmem:[%s3987_s3 + $0x110] sm:$0xff]  ;;  %v462_v14 = vadd.f32 %v2840_v18, %v270_v31  ;;  %v461_v32 = vadd.f32 %v2774_v33, %v269_v37 }
  0xfa   :  { %v2894_v36 = vpop.permute.xlu2 %435  ;;  %2191 = vtanh.f32 %v468_v47  ;;  %v460_v18 = vadd.f32 %v2819_v0, %v268_v11  ;;  %v266_v33 = vmul.f32 %v2835_v8, %v2660_v51  ;;  %v557_v0 = vld [vmem:[%s3987_s3 + $0x118] sm:$0xff] }
  0xfb   :  { %v2898_v54 = vpop.permute.xlu1 %385  ;;  %2193 = vtanh.f32 %v467_v4  ;;  %v459_v4 = vadd.f32 %v2821_v1, %v267_v56  ;;  %v568_v56 = vld [vmem:[%s3987_s3 + $0x170] sm:$0xff] }
  0xfc   :  { %v2900_v58 = vpop.permute.xlu0 %380  ;;  %v2184_v49 = vpop.eup %2183  ;;  %2195 = vtanh.f32 %v466_v2 }
  0xfd   :  { %1054 = vmatpush.msra.mxu2 %v2184_v49  ;;  %v2186_v59 = vpop.eup %2185  ;;  %2197 = vtanh.f32 %v465_v12  ;;  %v560_v12 = vld [vmem:[%s3987_s3 + $0x130] sm:$0xff] }
  0xfe   :  { %v2188_v48 = vpop.eup %2187  ;;  %2199 = vtanh.f32 %v464_v62 }
  0xff   :  { %1055 = vmatpush.msra.mxu2 %v2186_v59  ;;  %v2190_v19 = vpop.eup %2189  ;;  %2201 = vtanh.f32 %v463_v55  ;;  %v565_v55 = vld [vmem:[%s3987_s3 + $0x158] sm:$0xff] }
 0x100   :  { %744 = vperm.xlu2 %2179, %v553_v44   ;;  %v2192_v63 = vpop.eup %2191  ;;  %2203 = vtanh.f32 %v462_v14  ;;  %v559_v44 = vld [vmem:[%s3987_s3 + $0x128] sm:$0xff] }
 0x101   :  { %739 = vperm.xlu1 %2178, %v552_v5   ;;  %734 = vperm.xlu0 %2177, %v551_v46   ;;  %v2194_v17 = vpop.eup %2193  ;;  %2205 = vtanh.f32 %v461_v32  ;;  %v458_v5 = vadd.f32 %v2759_v27, %v266_v33  ;;  %v562_v27 = vld [vmem:[%s3987_s3 + $0x140] sm:$0xff] }
 0x102   :  { %1056 = vmatpush.msra.mxu2 %v2188_v48  ;;  %v2918_v13 = vpop.permute.xlu2 %450  ;;  %v2196_v26 = vpop.eup %2195  ;;  %2207 = vtanh.f32 %v460_v18 }
 0x103   :  { %v2923_v30 = vpop.permute.xlu1 %400  ;;  %v2198_v47 = vpop.eup %2197  ;;  %2209 = vtanh.f32 %v459_v4  ;;  %v292_v4 = vmul.f32 %v2835_v8, %v2731_v15  ;;  %v570_v15 = vld [vmem:[%s3987_s3 + $0x180] sm:$0xff] }
 0x104   :  { %v2925_v24 = vpop.permute.xlu0 %395  ;;  %1057 = vmatpush.msra.mxu2 %v2190_v19  ;;  %v2200_v50 = vpop.eup %2199  ;;  %2211 = vtanh.f32 %v458_v5  ;;  %v571_v5 = vld [vmem:[%s3987_s3 + $0x188] sm:$0xff] }
 0x105   :  { %v2202_v59 = vpop.eup %2201 }
 0x106   :  { %1058 = vmatpush.msra.mxu2 %v2192_v63  ;;  %v2204_v51 = vpop.eup %2203 }
 0x107   :  { %v2206_v46 = vpop.eup %2205 }
 0x108   :  { %1059 = vmatpush.msra.mxu2 %v2194_v17  ;;  %791 = vperm.xlu2 %2179, %v556_v10   ;;  %v2208_v48 = vpop.eup %2207  ;;  %v564_v10 = vld [vmem:[%s3987_s3 + $0x150] sm:$0xff]  ;;  %v296_v17 = vmul.f32 %v2835_v8, %v2808_v53  ;;  %v566_v53 = vld [vmem:[%s3987_s3 + $0x160] sm:$0xff] }
 0x109   :  { %786 = vperm.xlu1 %2178, %v555_v41   ;;  %781 = vperm.xlu0 %2177, %v554_v40   ;;  %v2210_v19 = vpop.eup %2209  ;;  %v563_v41 = vld [vmem:[%s3987_s3 + $0x148] sm:$0xff]  ;;  %v297_v40 = vmul.f32 %v2835_v8, %v2806_v52 }
 0x10a   :  { %1060 = vmatpush.msra.mxu2 %v2196_v26  ;;  %v2945_v38 = vpop.permute.xlu2 %594  ;;  %v2212_v20 = vpop.eup %2211  ;;  %v488_v11 = vadd.f32 %v2918_v13, %v296_v17  ;;  %v567_v52 = vld [vmem:[%s3987_s3 + $0x168] sm:$0xff]  ;;  %v294_v13 = vmul.f32 %v2835_v8, %v2791_v42 }
 0x10b   :  { %v2950_v49 = vpop.permute.xlu1 %415 }
 0x10c   :  { %v2952_v60 = vpop.permute.xlu0 %410  ;;  %1061 = vmatpush.msra.mxu2 %v2198_v47  ;;  %v295_v47 = vmul.f32 %v2835_v8, %v2744_v21  ;;  %v293_v21 = vmul.f32 %v2835_v8, %v2793_v43 }
 0x10e   :  { %1062 = vmatpush.msra.mxu2 %v2200_v50 }
 0x110   :  { %1063 = vmatpush.msra.mxu2 %v2202_v59  ;;  %806 = vperm.xlu2 %2179, %v559_v44   ;;  %v485_v44 = vadd.f32 %v2894_v36, %v293_v21  ;;  %v291_v59 = vmul.f32 %v2835_v8, %v2776_v34  ;;  %v569_v36 = vld [vmem:[%s3987_s3 + $0x178] sm:$0xff] }
 0x111   :  { %801 = vperm.xlu1 %2178, %v558_v57   ;;  %796 = vperm.xlu0 %2177, %v557_v0  }
 0x112   :  { %1064 = vmatpush.msra.mxu2 %v2204_v51  ;;  %v2967_v1 = vpop.permute.xlu2 %609 }
 0x113   :  { %v431_v45 = vpop.permute.xlu1 %430 }
 0x114   :  { %v426_v2 = vpop.permute.xlu0 %425  ;;  %1065 = vmatpush.msra.mxu2 %v2206_v46  ;;  %v484_v43 = vadd.f32 %v431_v45, %v292_v4  ;;  %v290_v46 = vmul.f32 %v2835_v8, %v2778_v35  ;;  %v288_v35 = vmul.f32 %v2835_v8, %v2761_v28  ;;  %v573_v28 = vld [vmem:[%s3987_s3 + $0x198] sm:$0xff] }
 0x115   :  { %v483_v34 = vadd.f32 %v426_v2, %v291_v59 }
 0x116   :  { %1066 = vmatpush.msra.mxu2 %v2208_v48  ;;  %v289_v48 = vmul.f32 %v2835_v8, %v2716_v9 }
 0x118   :  { %1067 = vmatpush.msra.mxu2 %v2210_v19  ;;  %821 = vperm.xlu2 %2179, %v562_v27   ;;  %v482_v27 = vadd.f32 %v2877_v6, %v290_v46  ;;  %v481_v2 = vadd.f32 %v2950_v49, %v289_v48  ;;  %v287_v6 = vmul.f32 %v2835_v8, %v2763_v29  ;;  %v572_v49 = vld [vmem:[%s3987_s3 + $0x190] sm:$0xff]  ;;  %v582_v46 = vld [vmem:[%s3987_s3 + $0x1e0] sm:$0xff] }
 0x119   :  { %816 = vperm.xlu1 %2178, %v561_v7   ;;  %811 = vperm.xlu0 %2177, %v560_v12   ;;  %v286_v29 = vmul.f32 %v2835_v8, %v2701_v3  ;;  %v284_v3 = vmul.f32 %v2835_v8, %v2748_v23  ;;  %v576_v23 = vld [vmem:[%s3987_s3 + $0x1b0] sm:$0xff] }
 0x11a   :  { %1068 = vmatpush.msra.mxu2 %v2212_v20  ;;  %v2978_v62 = vpop.permute.xlu2 %624 }
 0x11b   :  { %v446_v63 = vpop.permute.xlu1 %445 }
 0x11c   :  { %v441_v31 = vpop.permute.xlu0 %440  ;;  %v487_v18 = vadd.f32 %v446_v63, %v295_v47  ;;  %v480_v63 = vadd.f32 %v2952_v60, %v288_v35  ;;  %v476_v47 = vadd.f32 %v2851_v25, %v284_v3  ;;  %v585_v35 = vld [vmem:[%s3987_s3 + $0x1f8] sm:$0xff] }
 0x11d   :  { %v486_v50 = vadd.f32 %v441_v31, %v294_v13  ;;  %v574_v31 = vld [vmem:[%s3987_s3 + $0x1a0] sm:$0xff] }
 0x120   :  { %836 = vperm.xlu2 %2179, %v565_v55  }
 0x121   :  { %831 = vperm.xlu1 %2178, %v564_v10   ;;  %826 = vperm.xlu0 %2177, %v563_v41   ;;  %v479_v10 = vadd.f32 %v2862_v39, %v287_v6  ;;  %v285_v41 = vmul.f32 %v2835_v8, %v2746_v22 }
 0x122   :  { %v2993_v37 = vpop.permute.xlu2 %639 }
 0x123   :  { %v2995_v14 = vpop.permute.xlu1 %589  ;;  %v477_v39 = vadd.f32 %v2925_v24, %v285_v41  ;;  %v575_v24 = vld [vmem:[%s3987_s3 + $0x1a8] sm:$0xff] }
 0x124   :  { %v456_v26 = vpop.permute.xlu0 %455  ;;  %v1098_v41 = vld [vmem:[%s3986_s2 + $0x228] sm:$0xff] }
 0x125   :  { %v489_v32 = vadd.f32 %v456_v26, %v297_v40  ;;  %v478_v40 = vadd.f32 %v2923_v30, %v286_v29  ;;  %v283_v30 = vmul.f32 %v2835_v8, %v2686_v61  ;;  %v282_v61 = vmul.f32 %v2835_v8, %v2733_v16 }
 0x127   :  { %2213 = vtanh.f32 %v489_v32  ;;  %v475_v25 = vadd.f32 %v2898_v54, %v283_v30  ;;  %v474_v13 = vadd.f32 %v2900_v58, %v282_v61  ;;  %v580_v54 = vld [vmem:[%s3987_s3 + $0x1d0] sm:$0xff]  ;;  %v579_v58 = vld [vmem:[%s3987_s3 + $0x1c8] sm:$0xff]  ;;  %v1101_v30 = vld [vmem:[%s3986_s2 + $0x240] sm:$0xff] }
 0x128   :  { %2215 = vtanh.f32 %v488_v11  ;;  %851 = vperm.xlu2 %2179, %v568_v56   ;;  %v577_v56 = vld [vmem:[%s3987_s3 + $0x1b8] sm:$0xff] }
 0x129   :  { %846 = vperm.xlu1 %2178, %v567_v52   ;;  %841 = vperm.xlu0 %2177, %v566_v53   ;;  %2217 = vtanh.f32 %v487_v18  ;;  %v1104_v61 = vld [vmem:[%s3986_s2 + $0x258] sm:$0xff] }
 0x12a   :  { %v3013_v33 = vpop.permute.xlu2 %654  ;;  %2219 = vtanh.f32 %v486_v50 }
 0x12b   :  { %v3018_v57 = vpop.permute.xlu1 %604  ;;  %2221 = vtanh.f32 %v485_v44  ;;  %v578_v44 = vld [vmem:[%s3987_s3 + $0x1c0] sm:$0xff] }
 0x12c   :  { %v3020_v42 = vpop.permute.xlu0 %599  ;;  %2223 = vtanh.f32 %v484_v43 }
 0x12d   :  { %v2214_v0 = vpop.eup %2213  ;;  %2225 = vtanh.f32 %v483_v34  ;;  %v581_v34 = vld [vmem:[%s3987_s3 + $0x1d8] sm:$0xff] }
 0x12e   :  { %1073 = vmatpush.msra.mxu3 %v2214_v0  ;;  %v2216_v51 = vpop.eup %2215  ;;  %2227 = vtanh.f32 %v482_v27 }
 0x12f   :  { %v2218_v45 = vpop.eup %2217  ;;  %2229 = vtanh.f32 %v481_v2  ;;  %v584_v2 = vld [vmem:[%s3987_s3 + $0x1f0] sm:$0xff] }
 0x130   :  { %1074 = vmatpush.msra.mxu3 %v2216_v51  ;;  %866 = vperm.xlu2 %2179, %v571_v5   ;;  %v2220_v12 = vpop.eup %2219  ;;  %2231 = vtanh.f32 %v480_v63 }
 0x131   :  { %861 = vperm.xlu1 %2178, %v570_v15   ;;  %856 = vperm.xlu0 %2177, %v569_v36   ;;  %v2222_v9 = vpop.eup %2221  ;;  %2233 = vtanh.f32 %v479_v10  ;;  %v583_v36 = vld [vmem:[%s3987_s3 + $0x1e8] sm:$0xff] }
 0x132   :  { %1075 = vmatpush.msra.mxu3 %v2218_v45  ;;  %v3038_v7 = vpop.permute.xlu2 %669  ;;  %v2224_v55 = vpop.eup %2223  ;;  %2235 = vtanh.f32 %v478_v40  ;;  %v1097_v40 = vld [vmem:[%s3986_s2 + $0x220] sm:$0xff] }
 0x133   :  { %v3043_v19 = vpop.permute.xlu1 %619  ;;  %v2226_v60 = vpop.eup %2225  ;;  %2237 = vtanh.f32 %v477_v39 }
 0x134   :  { %v3045_v20 = vpop.permute.xlu0 %614  ;;  %1076 = vmatpush.msra.mxu3 %v2220_v12  ;;  %v2228_v26 = vpop.eup %2227  ;;  %2239 = vtanh.f32 %v476_v47  ;;  %v1093_v12 = vld [vmem:[%s3986_s2 + $0x200] sm:$0xff]  ;;  %v1100_v47 = vld [vmem:[%s3986_s2 + $0x238] sm:$0xff] }
 0x135   :  { %v2230_v22 = vpop.eup %2229  ;;  %2241 = vtanh.f32 %v475_v25  ;;  %v1103_v25 = vld [vmem:[%s3986_s2 + $0x250] sm:$0xff] }
 0x136   :  { %1077 = vmatpush.msra.mxu3 %v2222_v9  ;;  %v2232_v52 = vpop.eup %2231  ;;  %2243 = vtanh.f32 %v474_v13 }
 0x137   :  { %v2234_v53 = vpop.eup %2233 }
 0x138   :  { %1078 = vmatpush.msra.mxu3 %v2224_v55  ;;  %881 = vperm.xlu2 %2179, %v574_v31   ;;  %v2236_v21 = vpop.eup %2235  ;;  %v1096_v31 = vld [vmem:[%s3986_s2 + $0x218] sm:$0xff] }
 0x139   :  { %876 = vperm.xlu1 %2178, %v573_v28   ;;  %871 = vperm.xlu0 %2177, %v572_v49   ;;  %v2238_v16 = vpop.eup %2237  ;;  %v1095_v28 = vld [vmem:[%s3986_s2 + $0x210] sm:$0xff]  ;;  %v1094_v49 = vld [vmem:[%s3986_s2 + $0x208] sm:$0xff] }
 0x13a   :  { %1079 = vmatpush.msra.mxu3 %v2226_v60  ;;  %v3065_v17 = vpop.permute.xlu2 %684  ;;  %v2240_v0 = vpop.eup %2239  ;;  %v1099_v60 = vld [vmem:[%s3986_s2 + $0x230] sm:$0xff] }
 0x13b   :  { %v3070_v11 = vpop.permute.xlu1 %634  ;;  %v2242_v59 = vpop.eup %2241 }
 0x13c   :  { %v3072_v32 = vpop.permute.xlu0 %629  ;;  %1080 = vmatpush.msra.mxu3 %v2228_v26  ;;  %v2244_v5 = vpop.eup %2243 }
 0x13e   :  { %1081 = vmatpush.msra.mxu3 %v2230_v22  ;;  %v1102_v22 = vld [vmem:[%s3986_s2 + $0x248] sm:$0xff] }
 0x140   :  { %1082 = vmatpush.msra.mxu3 %v2232_v52  ;;  %896 = vperm.xlu2 %2179, %v577_v56   ;;  %v1105_v52 = vld [vmem:[%s3986_s2 + $0x260] sm:$0xff] }
 0x141   :  { %891 = vperm.xlu1 %2178, %v576_v23   ;;  %886 = vperm.xlu0 %2177, %v575_v24  }
 0x142   :  { %1083 = vmatpush.msra.mxu3 %v2234_v53  ;;  %v3090_v18 = vpop.permute.xlu2 %699 }
 0x143   :  { %v3092_v50 = vpop.permute.xlu1 %649 }
 0x144   :  { %v3094_v4 = vpop.permute.xlu0 %644  ;;  %1084 = vmatpush.msra.mxu3 %v2236_v21 }
 0x146   :  { %1085 = vmatpush.msra.mxu3 %v2238_v16  ;;  %v1108_v16 = vld [vmem:[%s3986_s2 + $0x278] sm:$0xff] }
 0x148   :  { %1086 = vmatpush.msra.mxu3 %v2240_v0  ;;  %911 = vperm.xlu2 %2179, %v580_v54   ;;  %v1107_v54 = vld [vmem:[%s3986_s2 + $0x270] sm:$0xff] }
 0x149   :  { %906 = vperm.xlu1 %2178, %v579_v58   ;;  %901 = vperm.xlu0 %2177, %v578_v44   ;;  %v1106_v58 = vld [vmem:[%s3986_s2 + $0x268] sm:$0xff] }
 0x14a   :  { %1087 = vmatpush.msra.mxu3 %v2242_v59  ;;  %v3105_v43 = vpop.permute.xlu2 %714 }
 0x14b   :  { %v3107_v51 = vpop.permute.xlu1 %664 }
 0x14c   :  { %v3109_v15 = vpop.permute.xlu0 %659  ;;  %1088 = vmatpush.msra.mxu3 %v2244_v5  ;;  %v1111_v5 = vld [vmem:[%s3986_s2 + $0x290] sm:$0xff] }
 0x150   :  { %926 = vperm.xlu2 %2179, %v583_v36   ;;  %v1110_v36 = vld [vmem:[%s3986_s2 + $0x288] sm:$0xff] }
 0x151   :  { %921 = vperm.xlu1 %2178, %v582_v46   ;;  %916 = vperm.xlu0 %2177, %v581_v34   ;;  %v1109_v46 = vld [vmem:[%s3986_s2 + $0x280] sm:$0xff] }
 0x152   :  { %v3120_v45 = vpop.permute.xlu2 %729 }
 0x153   :  { %v3122_v48 = vpop.permute.xlu1 %679 }
 0x154   :  { %v3124_v27 = vpop.permute.xlu0 %674 }
 0x158   :  { %1160 = vperm.xlu2 %2179, %v1093_v12  }
 0x159   :  { %936 = vperm.xlu1 %2178, %v585_v35   ;;  %931 = vperm.xlu0 %2177, %v584_v2   ;;  %v1114_v2 = vld [vmem:[%s3986_s2 + $0x2a8] sm:$0xff] }
 0x15a   :  { %v3135_v9 = vpop.permute.xlu2 %744 }
 0x15b   :  { %v3137_v6 = vpop.permute.xlu1 %694 }
 0x15c   :  { %v3139_v63 = vpop.permute.xlu0 %689 }
 0x160   :  { %1175 = vperm.xlu2 %2179, %v1096_v31   ;;  %v1113_v31 = vld [vmem:[%s3986_s2 + $0x2a0] sm:$0xff] }
 0x161   :  { %1170 = vperm.xlu1 %2178, %v1095_v28   ;;  %1165 = vperm.xlu0 %2177, %v1094_v49   ;;  %v1112_v28 = vld [vmem:[%s3986_s2 + $0x298] sm:$0xff] }
 0x162   :  { %v3150_v55 = vpop.permute.xlu2 %791 }
 0x163   :  { %v3152_v29 = vpop.permute.xlu1 %709 }
 0x164   :  { %v3154_v10 = vpop.permute.xlu0 %704 }
 0x168   :  { %1190 = vperm.xlu2 %2179, %v1099_v60  }
 0x169   :  { %1185 = vperm.xlu1 %2178, %v1098_v41   ;;  %1180 = vperm.xlu0 %2177, %v1097_v40   ;;  %v1117_v40 = vld [vmem:[%s3986_s2 + $0x2c0] sm:$0xff] }
 0x16a   :  { %v3165_v26 = vpop.permute.xlu2 %806 }
 0x16b   :  { %v3167_v3 = vpop.permute.xlu1 %724 }
 0x16c   :  { %v3169_v39 = vpop.permute.xlu0 %719 }
 0x170   :  { %1205 = vperm.xlu2 %2179, %v1102_v22   ;;  %v1116_v22 = vld [vmem:[%s3986_s2 + $0x2b8] sm:$0xff] }
 0x171   :  { %1200 = vperm.xlu1 %2178, %v1101_v30   ;;  %1195 = vperm.xlu0 %2177, %v1100_v47   ;;  %v1115_v30 = vld [vmem:[%s3986_s2 + $0x2b0] sm:$0xff] }
 0x172   :  { %v3180_v56 = vpop.permute.xlu2 %821 }
 0x173   :  { %v3182_v23 = vpop.permute.xlu1 %739 }
 0x174   :  { %v3184_v24 = vpop.permute.xlu0 %734 }
 0x178   :  { %1220 = vperm.xlu2 %2179, %v1105_v52  }
 0x179   :  { %1215 = vperm.xlu1 %2178, %v1104_v61   ;;  %1210 = vperm.xlu0 %2177, %v1103_v25   ;;  %v1120_v25 = vld [vmem:[%s3986_s2 + $0x2d8] sm:$0xff] }
 0x17a   :  { %v3195_v53 = vpop.permute.xlu2 %836 }
 0x17b   :  { %v3197_v13 = vpop.permute.xlu1 %786 }
 0x17c   :  { %v3199_v21 = vpop.permute.xlu0 %781 }
 0x180   :  { %1235 = vperm.xlu2 %2179, %v1108_v16   ;;  %v1119_v16 = vld [vmem:[%s3986_s2 + $0x2d0] sm:$0xff] }
 0x181   :  { %1230 = vperm.xlu1 %2178, %v1107_v54   ;;  %1225 = vperm.xlu0 %2177, %v1106_v58   ;;  %v1118_v54 = vld [vmem:[%s3986_s2 + $0x2c8] sm:$0xff]  ;;  %v762_v58 = vmul.f32 %v2835_v8, %v3107_v51 }
 0x182   :  { %v852_v44 = vpop.permute.xlu2 %851  ;;  %v1122_v51 = vld [vmem:[%s3986_s2 + $0x2e8] sm:$0xff] }
 0x183   :  { %v3210_v0 = vpop.permute.xlu1 %801 }
 0x184   :  { %v3212_v59 = vpop.permute.xlu0 %796 }
 0x188   :  { %1250 = vperm.xlu2 %2179, %v1111_v5  }
 0x189   :  { %1245 = vperm.xlu1 %2178, %v1110_v36   ;;  %1240 = vperm.xlu0 %2177, %v1109_v46   ;;  %v761_v36 = vmul.f32 %v2835_v8, %v3109_v15  ;;  %v1121_v15 = vld [vmem:[%s3986_s2 + $0x2e0] sm:$0xff] }
 0x18a   :  { %v3223_v34 = vpop.permute.xlu2 %866 }
 0x18b   :  { %v3225_v12 = vpop.permute.xlu1 %816 }
 0x18c   :  { %v3227_v35 = vpop.permute.xlu0 %811 }
 0x190   :  { %1265 = vperm.xlu2 %2179, %v1114_v2  }
 0x191   :  { %1260 = vperm.xlu1 %2178, %v1113_v31   ;;  %1255 = vperm.xlu0 %2177, %v1112_v28   ;;  %v760_v28 = vmul.f32 %v2835_v8, %v3013_v33  ;;  %v758_v33 = vmul.f32 %v2835_v8, %v3094_v4  ;;  %v756_v4 = vmul.f32 %v2835_v8, %v3070_v11 }
 0x192   :  { %v3238_v49 = vpop.permute.xlu2 %881 }
 0x193   :  { %v832_v60 = vpop.permute.xlu1 %831 }
 0x194   :  { %v827_v41 = vpop.permute.xlu0 %826 }
 0x195   :  { %v948_v11 = vadd.f32 %v827_v41, %v756_v4 }
 0x198   :  { %1280 = vperm.xlu2 %2179, %v1117_v40   ;;  %v953_v40 = vadd.f32 %v852_v44, %v761_v36 }
 0x199   :  { %1275 = vperm.xlu1 %2178, %v1116_v22   ;;  %1270 = vperm.xlu0 %2177, %v1115_v30   ;;  %v1123_v22 = vld [vmem:[%s3986_s2 + $0x2f0] sm:$0xff]  ;;  %v759_v30 = vmul.f32 %v2835_v8, %v3092_v50 }
 0x19a   :  { %v3249_v47 = vpop.permute.xlu2 %896 }
 0x19b   :  { %v847_v52 = vpop.permute.xlu1 %846 }
 0x19c   :  { %v842_v61 = vpop.permute.xlu0 %841 }
 0x19d   :  { %v951_v44 = vadd.f32 %v842_v61, %v759_v30  ;;  %v1126_v61 = vld [vmem:[%s3987_s3 + $0x208] sm:$0xff] }
 0x1a0   :  { %1295 = vperm.xlu2 %2179, %v1120_v25   ;;  %v952_v25 = vadd.f32 %v847_v52, %v760_v28  ;;  %v755_v28 = vmul.f32 %v2835_v8, %v3072_v32  ;;  %v753_v32 = vmul.f32 %v2835_v8, %v3043_v19  ;;  %v1128_v19 = vld [vmem:[%s3987_s3 + $0x218] sm:$0xff] }
 0x1a1   :  { %1290 = vperm.xlu1 %2178, %v1119_v16   ;;  %1285 = vperm.xlu0 %2177, %v1118_v54   ;;  %v757_v54 = vmul.f32 %v2835_v8, %v2993_v37  ;;  %v1125_v37 = vld [vmem:[%s3987_s3 + $0x200] sm:$0xff] }
 0x1a2   :  { %v3262_v5 = vpop.permute.xlu2 %911 }
 0x1a3   :  { %v3266_v46 = vpop.permute.xlu1 %861 }
 0x1a4   :  { %v857_v2 = vpop.permute.xlu0 %856 }
 0x1a5   :  { %v954_v31 = vadd.f32 %v857_v2, %v762_v58  ;;  %v950_v58 = vadd.f32 %v3195_v53, %v758_v33  ;;  %v949_v2 = vadd.f32 %v832_v60, %v757_v54  ;;  %v1124_v53 = vld [vmem:[%s3986_s2 + $0x2f8] sm:$0xff]  ;;  %v945_v33 = vadd.f32 %v3227_v35, %v753_v32 }
 0x1a7   :  { %2245 = vtanh.f32 %v954_v31 }
 0x1a8   :  { %1310 = vperm.xlu2 %2179, %v1123_v22   ;;  %2247 = vtanh.f32 %v953_v40  ;;  %v754_v40 = vmul.f32 %v2835_v8, %v2978_v62  ;;  %v947_v22 = vadd.f32 %v3180_v56, %v755_v28  ;;  %v752_v56 = vmul.f32 %v2835_v8, %v3045_v20  ;;  %v1132_v28 = vld [vmem:[%s3987_s3 + $0x238] sm:$0xff] }
 0x1a9   :  { %1305 = vperm.xlu1 %2178, %v1122_v51   ;;  %1300 = vperm.xlu0 %2177, %v1121_v15   ;;  %2249 = vtanh.f32 %v952_v25  ;;  %v751_v20 = vmul.f32 %v2835_v8, %v2967_v1  ;;  %v749_v1 = vmul.f32 %v2835_v8, %v3020_v42  ;;  %v1131_v42 = vld [vmem:[%s3987_s3 + $0x230] sm:$0xff] }
 0x1aa   :  { %v3283_v16 = vpop.permute.xlu2 %926  ;;  %2251 = vtanh.f32 %v951_v44  ;;  %v946_v41 = vadd.f32 %v3225_v12, %v754_v40  ;;  %v1129_v44 = vld [vmem:[%s3987_s3 + $0x220] sm:$0xff]  ;;  %v1127_v12 = vld [vmem:[%s3987_s3 + $0x210] sm:$0xff] }
 0x1ab   :  { %v3288_v36 = vpop.permute.xlu1 %876  ;;  %2253 = vtanh.f32 %v950_v58  ;;  %v944_v58 = vadd.f32 %v3165_v26, %v752_v56  ;;  %v943_v4 = vadd.f32 %v3210_v0, %v751_v20  ;;  %v748_v0 = vmul.f32 %v2835_v8, %v2945_v38 }
 0x1ac   :  { %v3290_v50 = vpop.permute.xlu0 %871  ;;  %2255 = vtanh.f32 %v949_v2  ;;  %v747_v38 = vmul.f32 %v2835_v8, %v2995_v14 }
 0x1ad   :  { %v2246_v52 = vpop.eup %2245  ;;  %2257 = vtanh.f32 %v948_v11 }
 0x1ae   :  { %1008 = vmatpush.msra.mxu0 %v2246_v52  ;;  %v2248_v31 = vpop.eup %2247  ;;  %2259 = vtanh.f32 %v947_v22  ;;  %v750_v52 = vmul.f32 %v2835_v8, %v3018_v57  ;;  %v939_v40 = vadd.f32 %v3199_v21, %v747_v38  ;;  %v1134_v21 = vld [vmem:[%s3987_s3 + $0x248] sm:$0xff] }
 0x1af   :  { %v2250_v60 = vpop.eup %2249  ;;  %2261 = vtanh.f32 %v946_v41 }
 0x1b0   :  { %1009 = vmatpush.msra.mxu0 %v2248_v31  ;;  %1357 = vperm.xlu2 %2179, %v1126_v61   ;;  %v2252_v15 = vpop.eup %2251  ;;  %2263 = vtanh.f32 %v945_v33  ;;  %v942_v26 = vadd.f32 %v3212_v59, %v750_v52  ;;  %v941_v31 = vadd.f32 %v3150_v55, %v749_v1  ;;  %v1130_v59 = vld [vmem:[%s3987_s3 + $0x228] sm:$0xff]  ;;  %v940_v55 = vadd.f32 %v3197_v13, %v748_v0  ;;  %v1135_v13 = vld [vmem:[%s3987_s3 + $0x250] sm:$0xff] }
 0x1b1   :  { %1352 = vperm.xlu1 %2178, %v1125_v37   ;;  %1315 = vperm.xlu0 %2177, %v1124_v53   ;;  %v2254_v62 = vpop.eup %2253  ;;  %2265 = vtanh.f32 %v944_v58 }
 0x1b2   :  { %1010 = vmatpush.msra.mxu0 %v2250_v60  ;;  %v3308_v51 = vpop.permute.xlu2 %1160  ;;  %v2256_v54 = vpop.eup %2255  ;;  %2267 = vtanh.f32 %v943_v4 }
 0x1b3   :  { %v3313_v30 = vpop.permute.xlu1 %891  ;;  %v2258_v35 = vpop.eup %2257  ;;  %2269 = vtanh.f32 %v942_v26 }
 0x1b4   :  { %v3315_v25 = vpop.permute.xlu0 %886  ;;  %1011 = vmatpush.msra.mxu0 %v2252_v15  ;;  %v2260_v61 = vpop.eup %2259  ;;  %2271 = vtanh.f32 %v941_v31 }
 0x1b5   :  { %v2262_v57 = vpop.eup %2261  ;;  %2273 = vtanh.f32 %v940_v55  ;;  %v1139_v55 = vld [vmem:[%s3987_s3 + $0x270] sm:$0xff] }
 0x1b6   :  { %1012 = vmatpush.msra.mxu0 %v2254_v62  ;;  %v2264_v11 = vpop.eup %2263  ;;  %2275 = vtanh.f32 %v939_v40  ;;  %v1133_v62 = vld [vmem:[%s3987_s3 + $0x240] sm:$0xff] }
 0x1b7   :  { %v2266_v60 = vpop.eup %2265 }
 0x1b8   :  { %1013 = vmatpush.msra.mxu0 %v2256_v54  ;;  %1372 = vperm.xlu2 %2179, %v1129_v44   ;;  %v2268_v15 = vpop.eup %2267  ;;  %v778_v44 = vmul.f32 %v2835_v8, %v3135_v9  ;;  %v1138_v9 = vld [vmem:[%s3987_s3 + $0x268] sm:$0xff] }
 0x1b9   :  { %1367 = vperm.xlu1 %2178, %v1128_v19   ;;  %1362 = vperm.xlu0 %2177, %v1127_v12   ;;  %v2270_v14 = vpop.eup %2269  ;;  %v3376_v19 = vld [vmem:[%s3985_s1] ss:$0 sm:$0xff] }
 0x1ba   :  { %1014 = vmatpush.msra.mxu0 %v2258_v35  ;;  %v3335_v2 = vpop.permute.xlu2 %1175  ;;  %v2272_v56 = vpop.eup %2271  ;;  %v777_v12 = vmul.f32 %v3376_v19, %v3182_v23  ;;  %v776_v8 = vmul.f32 %v3376_v19, %v3184_v24  ;;  %v1137_v23 = vld [vmem:[%s3987_s3 + $0x260] sm:$0xff]  ;;  %v775_v1 = vmul.f32 %v3376_v19, %v3120_v45  ;;  %v774_v24 = vmul.f32 %v3376_v19, %v3167_v3 }
 0x1bb   :  { %v3340_v37 = vpop.permute.xlu1 %906  ;;  %v2274_v33 = vpop.eup %2273  ;;  %v773_v31 = vmul.f32 %v3376_v19, %v3169_v39  ;;  %v1140_v39 = vld [vmem:[%s3987_s3 + $0x278] sm:$0xff]  ;;  %v770_v40 = vmul.f32 %v3376_v19, %v3154_v10 }
 0x1bc   :  { %v3342_v53 = vpop.permute.xlu0 %901  ;;  %1015 = vmatpush.msra.mxu0 %v2260_v61  ;;  %v2276_v20 = vpop.eup %2275  ;;  %v1136_v61 = vld [vmem:[%s3987_s3 + $0x258] sm:$0xff]  ;;  %v968_v26 = vadd.f32 %v3283_v16, %v776_v8  ;;  %v1147_v8 = vld [vmem:[%s3987_s3 + $0x2b0] sm:$0xff] }
 0x1bd   :  { %v965_v3 = vadd.f32 %v3262_v5, %v773_v31  ;;  %v1148_v31 = vld [vmem:[%s3987_s3 + $0x2b8] sm:$0xff] }
 0x1be   :  { %1016 = vmatpush.msra.mxu0 %v2262_v57 }
 0x1c0   :  { %1017 = vmatpush.msra.mxu0 %v2264_v11  ;;  %1387 = vperm.xlu2 %2179, %v1132_v28   ;;  %v1141_v11 = vld [vmem:[%s3987_s3 + $0x280] sm:$0xff] }
 0x1c1   :  { %1382 = vperm.xlu1 %2178, %v1131_v42   ;;  %1377 = vperm.xlu0 %2177, %v1130_v59   ;;  %v772_v59 = vmul.f32 %v3376_v19, %v3105_v43  ;;  %v771_v43 = vmul.f32 %v3376_v19, %v3152_v29  ;;  %v769_v29 = vmul.f32 %v3376_v19, %v3090_v18  ;;  %v1143_v18 = vld [vmem:[%s3987_s3 + $0x290] sm:$0xff] }
 0x1c2   :  { %1018 = vmatpush.msra.mxu0 %v2266_v60  ;;  %v3360_v22 = vpop.permute.xlu2 %1190 }
 0x1c3   :  { %v922_v32 = vpop.permute.xlu1 %921  ;;  %v964_v5 = vadd.f32 %v3340_v37, %v772_v59  ;;  %v962_v37 = vadd.f32 %v3249_v47, %v770_v40  ;;  %v1142_v47 = vld [vmem:[%s3987_s3 + $0x288] sm:$0xff] }
 0x1c4   :  { %v917_v41 = vpop.permute.xlu0 %916  ;;  %1019 = vmatpush.msra.mxu0 %v2268_v15  ;;  %v967_v57 = vadd.f32 %v922_v32, %v775_v1  ;;  %v963_v15 = vadd.f32 %v3342_v53, %v771_v43  ;;  %v768_v53 = vmul.f32 %v3376_v19, %v3137_v6  ;;  %v767_v6 = vmul.f32 %v3376_v19, %v3139_v63  ;;  %v1151_v43 = vld [vmem:[%s3987_s3 + $0x2d0] sm:$0xff] }
 0x1c5   :  { %v966_v28 = vadd.f32 %v917_v41, %v774_v24  ;;  %v765_v63 = vmul.f32 %v3376_v19, %v3122_v48  ;;  %v1146_v48 = vld [vmem:[%s3987_s3 + $0x2a8] sm:$0xff] }
 0x1c6   :  { %1020 = vmatpush.msra.mxu0 %v2270_v14 }
 0x1c8   :  { %1021 = vmatpush.msra.mxu0 %v2272_v56  ;;  %1402 = vperm.xlu2 %2179, %v1135_v13  }
 0x1c9   :  { %1397 = vperm.xlu1 %2178, %v1134_v21   ;;  %1392 = vperm.xlu0 %2177, %v1133_v62   ;;  %v961_v21 = vadd.f32 %v3313_v30, %v769_v29  ;;  %v1144_v62 = vld [vmem:[%s3987_s3 + $0x298] sm:$0xff]  ;;  %v960_v30 = vadd.f32 %v3315_v25, %v768_v53  ;;  %v1154_v29 = vld [vmem:[%s3987_s3 + $0x2e8] sm:$0xff] }
 0x1ca   :  { %1022 = vmatpush.msra.mxu0 %v2274_v33  ;;  %v3380_v54 = vpop.permute.xlu2 %1205 }
 0x1cb   :  { %v937_v58 = vpop.permute.xlu1 %936 }
 0x1cc   :  { %v932_v35 = vpop.permute.xlu0 %931  ;;  %v970_v52 = vadd.f32 %v937_v58, %v778_v44  ;;  %1023 = vmatpush.msra.mxu0 %v2276_v20  ;;  %v766_v44 = vmul.f32 %v3376_v19, %v3065_v17 }
 0x1cd   :  { %v969_v4 = vadd.f32 %v932_v35, %v777_v12  ;;  %v959_v12 = vadd.f32 %v3238_v49, %v767_v6  ;;  %v764_v49 = vmul.f32 %v3376_v19, %v3124_v27  ;;  %v763_v27 = vmul.f32 %v3376_v19, %v3038_v7 }
 0x1ce   :  { %2277 = vtanh.f32 %v970_v52  ;;  %v958_v25 = vadd.f32 %v3288_v36, %v766_v44  ;;  %v1145_v36 = vld [vmem:[%s3987_s3 + $0x2a0] sm:$0xff]  ;;  %v1625_v44 = vld [vmem:[%s3986_s2 + $0x328] sm:$0xff] }
 0x1cf   :  { %2279 = vtanh.f32 %v969_v4  ;;  %v957_v4 = vadd.f32 %v3290_v50, %v765_v63 }
 0x1d0   :  { %1417 = vperm.xlu2 %2179, %v1138_v9   ;;  %2281 = vtanh.f32 %v968_v26 }
 0x1d1   :  { %1412 = vperm.xlu1 %2178, %v1137_v23   ;;  %1407 = vperm.xlu0 %2177, %v1136_v61   ;;  %2283 = vtanh.f32 %v967_v57  ;;  %v956_v23 = vadd.f32 %v3223_v34, %v764_v49  ;;  %v955_v61 = vadd.f32 %v3266_v46, %v763_v27  ;;  %v1150_v34 = vld [vmem:[%s3987_s3 + $0x2c8] sm:$0xff]  ;;  %v1149_v46 = vld [vmem:[%s3987_s3 + $0x2c0] sm:$0xff] }
 0x1d2   :  { %v3398_v0 = vpop.permute.xlu2 %1220  ;;  %2285 = vtanh.f32 %v966_v28 }
 0x1d3   :  { %v3402_v42 = vpop.permute.xlu1 %1170  ;;  %2287 = vtanh.f32 %v965_v3 }
 0x1d4   :  { %v3404_v45 = vpop.permute.xlu0 %1165  ;;  %v2278_v16 = vpop.eup %2277  ;;  %2289 = vtanh.f32 %v964_v5 }
 0x1d5   :  { %1028 = vmatpush.msra.mxu1 %v2278_v16  ;;  %v2280_v38 = vpop.eup %2279  ;;  %2291 = vtanh.f32 %v963_v15  ;;  %v1156_v15 = vld [vmem:[%s3987_s3 + $0x2f8] sm:$0xff] }
 0x1d6   :  { %v2282_v60 = vpop.eup %2281  ;;  %2293 = vtanh.f32 %v962_v37 }
 0x1d7   :  { %1029 = vmatpush.msra.mxu1 %v2280_v38  ;;  %v2284_v41 = vpop.eup %2283  ;;  %2295 = vtanh.f32 %v961_v21  ;;  %v1622_v21 = vld [vmem:[%s3986_s2 + $0x310] sm:$0xff] }
 0x1d8   :  { %1432 = vperm.xlu2 %2179, %v1141_v11   ;;  %v2286_v10 = vpop.eup %2285  ;;  %2297 = vtanh.f32 %v960_v30 }
 0x1d9   :  { %1427 = vperm.xlu1 %2178, %v1140_v39   ;;  %1422 = vperm.xlu0 %2177, %v1139_v55   ;;  %v2288_v56 = vpop.eup %2287  ;;  %2299 = vtanh.f32 %v959_v12  ;;  %v1153_v39 = vld [vmem:[%s3987_s3 + $0x2e0] sm:$0xff]  ;;  %v1152_v55 = vld [vmem:[%s3987_s3 + $0x2d8] sm:$0xff] }
 0x1da   :  { %1030 = vmatpush.msra.mxu1 %v2282_v60  ;;  %v3424_v32 = vpop.permute.xlu2 %1235  ;;  %v2290_v33 = vpop.eup %2289  ;;  %2301 = vtanh.f32 %v958_v25  ;;  %v1624_v12 = vld [vmem:[%s3986_s2 + $0x320] sm:$0xff] }
 0x1db   :  { %v3429_v14 = vpop.permute.xlu1 %1185  ;;  %v2292_v58 = vpop.eup %2291  ;;  %2303 = vtanh.f32 %v957_v4  ;;  %v1628_v4 = vld [vmem:[%s3986_s2 + $0x340] sm:$0xff] }
 0x1dc   :  { %v3431_v13 = vpop.permute.xlu0 %1180  ;;  %1031 = vmatpush.msra.mxu1 %v2284_v41  ;;  %v2294_v17 = vpop.eup %2293  ;;  %2305 = vtanh.f32 %v956_v23  ;;  %v1155_v41 = vld [vmem:[%s3987_s3 + $0x2f0] sm:$0xff] }
 0x1dd   :  { %v2296_v9 = vpop.eup %2295  ;;  %2307 = vtanh.f32 %v955_v61  ;;  %v1630_v61 = vld [vmem:[%s3986_s2 + $0x350] sm:$0xff] }
 0x1de   :  { %1032 = vmatpush.msra.mxu1 %v2286_v10  ;;  %v2298_v50 = vpop.eup %2297 }
 0x1df   :  { %v2300_v26 = vpop.eup %2299 }
 0x1e0   :  { %1033 = vmatpush.msra.mxu1 %v2288_v56  ;;  %1447 = vperm.xlu2 %2179, %v1144_v62   ;;  %v2302_v7 = vpop.eup %2301  ;;  %v1621_v62 = vld [vmem:[%s3986_s2 + $0x308] sm:$0xff] }
 0x1e1   :  { %1442 = vperm.xlu1 %2178, %v1143_v18   ;;  %1437 = vperm.xlu0 %2177, %v1142_v47   ;;  %v2304_v28 = vpop.eup %2303  ;;  %v1620_v18 = vld [vmem:[%s3986_s2 + $0x300] sm:$0xff]  ;;  %v1319_v47 = vmul.f32 %v3376_v19, %v3404_v45  ;;  %v1623_v45 = vld [vmem:[%s3986_s2 + $0x318] sm:$0xff] }
 0x1e2   :  { %1034 = vmatpush.msra.mxu1 %v2290_v33  ;;  %v3451_v20 = vpop.permute.xlu2 %1250  ;;  %v2306_v16 = vpop.eup %2305 }
 0x1e3   :  { %v3456_v35 = vpop.permute.xlu1 %1200  ;;  %v2308_v3 = vpop.eup %2307 }
 0x1e4   :  { %v3458_v52 = vpop.permute.xlu0 %1195  ;;  %1035 = vmatpush.msra.mxu1 %v2292_v58  ;;  %v1322_v58 = vmul.f32 %v3376_v19, %v3431_v13  ;;  %v1626_v13 = vld [vmem:[%s3986_s2 + $0x330] sm:$0xff] }
 0x1e6   :  { %1036 = vmatpush.msra.mxu1 %v2294_v17 }
 0x1e8   :  { %1037 = vmatpush.msra.mxu1 %v2296_v9  ;;  %1462 = vperm.xlu2 %2179, %v1147_v8   ;;  %v1627_v8 = vld [vmem:[%s3986_s2 + $0x338] sm:$0xff] }
 0x1e9   :  { %1457 = vperm.xlu1 %2178, %v1146_v48   ;;  %1452 = vperm.xlu0 %2177, %v1145_v36   ;;  %v1325_v48 = vmul.f32 %v3376_v19, %v3458_v52  ;;  %v1629_v52 = vld [vmem:[%s3986_s2 + $0x348] sm:$0xff] }
 0x1ea   :  { %1038 = vmatpush.msra.mxu1 %v2298_v50  ;;  %v3476_v1 = vpop.permute.xlu2 %1265  ;;  %v1631_v50 = vld [vmem:[%s3986_s2 + $0x358] sm:$0xff] }
 0x1eb   :  { %v3478_v24 = vpop.permute.xlu1 %1215 }
 0x1ec   :  { %v3480_v57 = vpop.permute.xlu0 %1210  ;;  %1039 = vmatpush.msra.mxu1 %v2300_v26  ;;  %v1318_v26 = vmul.f32 %v3376_v19, %v3308_v51 }
 0x1ee   :  { %1040 = vmatpush.msra.mxu1 %v2302_v7 }
 0x1f0   :  { %1041 = vmatpush.msra.mxu1 %v2304_v28  ;;  %1477 = vperm.xlu2 %2179, %v1150_v34   ;;  %v1634_v28 = vld [vmem:[%s3986_s2 + $0x370] sm:$0xff] }
 0x1f1   :  { %1472 = vperm.xlu1 %2178, %v1149_v46   ;;  %1467 = vperm.xlu0 %2177, %v1148_v31  }
 0x1f2   :  { %1042 = vmatpush.msra.mxu1 %v2306_v16  ;;  %v3491_v59 = vpop.permute.xlu2 %1280  ;;  %v1633_v16 = vld [vmem:[%s3986_s2 + $0x368] sm:$0xff] }
 0x1f3   :  { %v3493_v11 = vpop.permute.xlu1 %1230 }
 0x1f4   :  { %v3495_v38 = vpop.permute.xlu0 %1225  ;;  %1043 = vmatpush.msra.mxu1 %v2308_v3  ;;  %v1632_v3 = vld [vmem:[%s3986_s2 + $0x360] sm:$0xff] }
 0x1f8   :  { %1492 = vperm.xlu2 %2179, %v1153_v39  }
 0x1f9   :  { %1487 = vperm.xlu1 %2178, %v1152_v55   ;;  %1482 = vperm.xlu0 %2177, %v1151_v43   ;;  %v1637_v43 = vld [vmem:[%s3986_s2 + $0x388] sm:$0xff] }
 0x1fa   :  { %v3506_v5 = vpop.permute.xlu2 %1295 }
 0x1fb   :  { %v3508_v60 = vpop.permute.xlu1 %1245 }
 0x1fc   :  { %v3510_v40 = vpop.permute.xlu0 %1240 }
 0x200   :  { %1507 = vperm.xlu2 %2179, %v1156_v15   ;;  %v1636_v15 = vld [vmem:[%s3986_s2 + $0x380] sm:$0xff] }
 0x201   :  { %1502 = vperm.xlu1 %2178, %v1155_v41   ;;  %1497 = vperm.xlu0 %2177, %v1154_v29   ;;  %v1635_v41 = vld [vmem:[%s3986_s2 + $0x378] sm:$0xff]  ;;  %v1334_v29 = vmul.f32 %v3376_v19, %v3510_v40  ;;  %v1638_v40 = vld [vmem:[%s3986_s2 + $0x390] sm:$0xff] }
 0x202   :  { %v3521_v37 = vpop.permute.xlu2 %1310 }
 0x203   :  { %v3523_v10 = vpop.permute.xlu1 %1260 }
 0x204   :  { %v3525_v53 = vpop.permute.xlu0 %1255 }
 0x208   :  { %1697 = vperm.xlu2 %2179, %v1622_v21  }
 0x209   :  { %1692 = vperm.xlu1 %2178, %v1621_v62   ;;  %1687 = vperm.xlu0 %2177, %v1620_v18  }
 0x20a   :  { %v1358_v56 = vpop.permute.xlu2 %1357 }
 0x20b   :  { %v3538_v6 = vadd.f32 %v1358_v56, %v1319_v47  ;;  %v3540_v30 = vpop.permute.xlu1 %1275  ;;  %v1640_v56 = vld [vmem:[%s3986_s2 + $0x3a0] sm:$0xff] }
 0x20c   :  { %v3542_v33 = vpop.permute.xlu0 %1270 }
 0x210   :  { %1712 = vperm.xlu2 %2179, %v1625_v44   ;;  %v1639_v44 = vld [vmem:[%s3986_s2 + $0x398] sm:$0xff] }
 0x211   :  { %1707 = vperm.xlu1 %2178, %v1624_v12   ;;  %1702 = vperm.xlu0 %2177, %v1623_v45   ;;  %v1337_v12 = vmul.f32 %v3376_v19, %v3525_v53  ;;  %v1340_v53 = vmul.f32 %v3376_v19, %v3542_v33  ;;  %v1333_v33 = vmul.f32 %v3376_v19, %v3424_v32  ;;  %v1650_v32 = vld [vmem:[%s3986_s2 + $0x3f0] sm:$0xff] }
 0x212   :  { %v1373_v63 = vpop.permute.xlu2 %1372 }
 0x213   :  { %v3555_v25 = vadd.f32 %v1373_v63, %v1322_v58  ;;  %v3557_v17 = vpop.permute.xlu1 %1290 }
 0x214   :  { %v3559_v49 = vpop.permute.xlu0 %1285 }
 0x218   :  { %1727 = vperm.xlu2 %2179, %v1628_v4  }
 0x219   :  { %1722 = vperm.xlu1 %2178, %v1627_v8   ;;  %1717 = vperm.xlu0 %2177, %v1626_v13   ;;  %v1643_v8 = vld [vmem:[%s3986_s2 + $0x3b8] sm:$0xff]  ;;  %v1642_v13 = vld [vmem:[%s3986_s2 + $0x3b0] sm:$0xff] }
 0x21a   :  { %v1388_v36 = vpop.permute.xlu2 %1387 }
 0x21b   :  { %v3572_v9 = vadd.f32 %v1388_v36, %v1325_v48  ;;  %v3574_v27 = vpop.permute.xlu1 %1305  ;;  %v1641_v48 = vld [vmem:[%s3986_s2 + $0x3a8] sm:$0xff] }
 0x21c   :  { %v3576_v23 = vpop.permute.xlu0 %1300 }
 0x220   :  { %1742 = vperm.xlu2 %2179, %v1631_v50  }
 0x221   :  { %1737 = vperm.xlu1 %2178, %v1630_v61   ;;  %1732 = vperm.xlu0 %2177, %v1629_v52  }
 0x222   :  { %v3589_v7 = vpop.permute.xlu2 %1402 }
 0x223   :  { %v1353_v34 = vpop.permute.xlu1 %1352 }
 0x224   :  { %v3591_v46 = vpop.permute.xlu0 %1315  ;;  %v3593_v31 = vadd.f32 %v1353_v34, %v1318_v26  ;;  %v1646_v26 = vld [vmem:[%s3986_s2 + $0x3d0] sm:$0xff]  ;;  %v1645_v34 = vld [vmem:[%s3986_s2 + $0x3c8] sm:$0xff] }
 0x228   :  { %1757 = vperm.xlu2 %2179, %v1634_v28   ;;  %v1644_v28 = vld [vmem:[%s3986_s2 + $0x3c0] sm:$0xff] }
 0x229   :  { %1752 = vperm.xlu1 %2178, %v1633_v16   ;;  %1747 = vperm.xlu0 %2177, %v1632_v3   ;;  %v1332_v16 = vmul.f32 %v3376_v19, %v3493_v11  ;;  %v1651_v11 = vld [vmem:[%s3986_s2 + $0x3f8] sm:$0xff] }
 0x22a   :  { %v1418_v51 = vpop.permute.xlu2 %1417 }
 0x22b   :  { %v3604_v39 = vpop.permute.xlu1 %1367 }
 0x22c   :  { %v3606_v55 = vpop.permute.xlu0 %1362 }
 0x230   :  { %1772 = vperm.xlu2 %2179, %v1637_v43  }
 0x231   :  { %1767 = vperm.xlu1 %2178, %v1636_v15   ;;  %1762 = vperm.xlu0 %2177, %v1635_v41  }
 0x232   :  { %v1433_v21 = vpop.permute.xlu2 %1432 }
 0x233   :  { %v3619_v62 = vadd.f32 %v1433_v21, %v1334_v29  ;;  %v3621_v18 = vpop.permute.xlu1 %1382  ;;  %v1331_v21 = vmul.f32 %v3376_v19, %v3495_v38  ;;  %v1329_v38 = vmul.f32 %v3376_v19, %v3478_v24 }
 0x234   :  { %v3623_v47 = vpop.permute.xlu0 %1377 }
 0x238   :  { %1787 = vperm.xlu2 %2179, %v1640_v56   ;;  %v1667_v56 = vld [vmem:[%s3987_s3 + $0x378] sm:$0xff] }
 0x239   :  { %1782 = vperm.xlu1 %2178, %v1639_v44   ;;  %1777 = vperm.xlu0 %2177, %v1638_v40   ;;  %v1330_v44 = vmul.f32 %v3376_v19, %v3398_v0  ;;  %v1523_v40 = vadd.f32 %v1418_v51, %v1331_v21  ;;  %v1327_v51 = vmul.f32 %v3376_v19, %v3380_v54  ;;  %v1683_v54 = vld [vmem:[%s3987_s3 + $0x3f8] sm:$0xff]  ;;  %v1682_v21 = vld [vmem:[%s3987_s3 + $0x3f0] sm:$0xff] }
 0x23a   :  { %v1448_v45 = vpop.permute.xlu2 %1447 }
 0x23b   :  { %v3636_v58 = vadd.f32 %v1448_v45, %v1337_v12  ;;  %v1398_v63 = vpop.permute.xlu1 %1397 }
 0x23c   :  { %v1393_v4 = vpop.permute.xlu0 %1392 }
 0x240   :  { %1802 = vperm.xlu2 %2179, %v1643_v8   ;;  %v1328_v8 = vmul.f32 %v3376_v19, %v3480_v57  ;;  %v1326_v57 = vmul.f32 %v3376_v19, %v3456_v35 }
 0x241   :  { %1797 = vperm.xlu1 %2178, %v1642_v13   ;;  %1792 = vperm.xlu0 %2177, %v1641_v48  }
 0x242   :  { %v1463_v36 = vpop.permute.xlu2 %1462  ;;  %v1520_v24 = vadd.f32 %v3589_v7, %v1328_v8  ;;  %v1518_v7 = vadd.f32 %v1393_v4, %v1326_v57  ;;  %v1679_v57 = vld [vmem:[%s3987_s3 + $0x3d8] sm:$0xff] }
 0x243   :  { %v3649_v50 = vadd.f32 %v1463_v36, %v1340_v53  ;;  %v1413_v61 = vpop.permute.xlu1 %1412  ;;  %v1666_v36 = vld [vmem:[%s3987_s3 + $0x370] sm:$0xff] }
 0x244   :  { %v1408_v52 = vpop.permute.xlu0 %1407  ;;  %v1522_v12 = vadd.f32 %v1413_v61, %v1330_v44 }
 0x245   :  { %v1521_v13 = vadd.f32 %v1408_v52, %v1329_v38  ;;  %v1649_v52 = vld [vmem:[%s3986_s2 + $0x3e8] sm:$0xff]  ;;  %v1320_v38 = vmul.f32 %v3376_v19, %v3402_v42  ;;  %v1647_v42 = vld [vmem:[%s3986_s2 + $0x3d8] sm:$0xff] }
 0x247   :  { %v1512_v8 = vadd.f32 %v3606_v55, %v1320_v38  ;;  %v1677_v38 = vld [vmem:[%s3987_s3 + $0x3c8] sm:$0xff] }
 0x248   :  { %1817 = vperm.xlu2 %2179, %v1646_v26   ;;  %v1519_v26 = vadd.f32 %v1398_v63, %v1327_v51 }
 0x249   :  { %1812 = vperm.xlu1 %2178, %v1645_v34   ;;  %1807 = vperm.xlu0 %2177, %v1644_v28   ;;  %v1349_v28 = vmul.f32 %v3376_v19, %v3591_v46  ;;  %v1323_v46 = vmul.f32 %v3376_v19, %v3429_v14 }
 0x24a   :  { %v3664_v3 = vpop.permute.xlu2 %1477 }
 0x24b   :  { %v1428_v43 = vpop.permute.xlu1 %1427  ;;  %v1515_v14 = vadd.f32 %v3623_v47, %v1323_v46  ;;  %v1661_v46 = vld [vmem:[%s3987_s3 + $0x348] sm:$0xff] }
 0x24c   :  { %v1423_v15 = vpop.permute.xlu0 %1422  ;;  %v1525_v41 = vadd.f32 %v1428_v43, %v1333_v33 }
 0x24d   :  { %v1524_v29 = vadd.f32 %v1423_v15, %v1332_v16  ;;  %v1324_v16 = vmul.f32 %v3376_v19, %v3360_v22  ;;  %v1648_v22 = vld [vmem:[%s3986_s2 + $0x3e0] sm:$0xff] }
 0x24e   :  { %2309 = vtanh.f32 %v1525_v41 }
 0x24f   :  { %2311 = vtanh.f32 %v1524_v29  ;;  %v1516_v41 = vadd.f32 %v3621_v18, %v1324_v16  ;;  %v1665_v29 = vld [vmem:[%s3987_s3 + $0x368] sm:$0xff] }
 0x250   :  { %1954 = vperm.xlu2 %2179, %v1667_v56   ;;  %2313 = vtanh.f32 %v1523_v40 }
 0x251   :  { %1837 = vperm.xlu1 %2178, %v1650_v32   ;;  %1842 = vperm.xlu0 %2177, %v1651_v11   ;;  %2315 = vtanh.f32 %v1522_v12  ;;  %v1321_v32 = vmul.f32 %v3376_v19, %v3335_v2 }
 0x252   :  { %v3681_v45 = vpop.permute.xlu2 %1492  ;;  %2317 = vtanh.f32 %v1521_v13  ;;  %v1664_v13 = vld [vmem:[%s3987_s3 + $0x360] sm:$0xff] }
 0x253   :  { %v3685_v48 = vpop.permute.xlu1 %1442  ;;  %2319 = vtanh.f32 %v1520_v24 }
 0x254   :  { %v3687_v53 = vpop.permute.xlu0 %1437  ;;  %v2310_v0 = vpop.eup %2309  ;;  %2321 = vtanh.f32 %v1519_v26 }
 0x255   :  { %1579 = vmatpush.msrb.mxu0 %v2310_v0  ;;  %v2312_v61 = vpop.eup %2311  ;;  %2323 = vtanh.f32 %v1518_v7  ;;  %v1347_v7 = vmul.f32 %v3376_v19, %v3574_v27  ;;  %v1662_v27 = vld [vmem:[%s3987_s3 + $0x350] sm:$0xff] }
 0x256   :  { %v2314_v34 = vpop.eup %2313 }
 0x257   :  { %1580 = vmatpush.msrb.mxu0 %v2312_v61  ;;  %v2316_v33 = vpop.eup %2315 }
 0x258   :  { %1949 = vperm.xlu2 %2179, %v1666_v36   ;;  %v2318_v4 = vpop.eup %2317 }
 0x259   :  { %1832 = vperm.xlu1 %2178, %v1649_v52   ;;  %2034 = vperm.xlu0 %2177, %v1683_v54   ;;  %v2320_v56 = vpop.eup %2319  ;;  %v1663_v52 = vld [vmem:[%s3987_s3 + $0x358] sm:$0xff]  ;;  %v1680_v54 = vld [vmem:[%s3987_s3 + $0x3e0] sm:$0xff] }
 0x25a   :  { %1581 = vmatpush.msrb.mxu0 %v2314_v34  ;;  %v1508_v35 = vpop.permute.xlu2 %1507  ;;  %v2322_v18 = vpop.eup %2321 }
 0x25b   :  { %v1541_v43 = vadd.f32 %v1508_v35, %v1349_v28  ;;  %v3707_v63 = vpop.permute.xlu1 %1457  ;;  %v2324_v11 = vpop.eup %2323 }
 0x25c   :  { %v3709_v15 = vpop.permute.xlu0 %1452  ;;  %1582 = vmatpush.msrb.mxu0 %v2316_v33 }
 0x25d   :  { %2325 = vtanh.f32 %v1541_v43 }
 0x25e   :  { %1583 = vmatpush.msrb.mxu0 %v2318_v4  ;;  %2327 = vtanh.f32 %v3572_v9  ;;  %v1513_v9 = vadd.f32 %v3604_v39, %v1321_v32  ;;  %v1681_v39 = vld [vmem:[%s3987_s3 + $0x3e8] sm:$0xff]  ;;  %v1346_v4 = vmul.f32 %v3376_v19, %v3576_v23  ;;  %v1344_v23 = vmul.f32 %v3376_v19, %v3557_v17 }
 0x25f   :  { %2329 = vtanh.f32 %v1516_v41  ;;  %v1345_v41 = vmul.f32 %v3376_v19, %v3506_v5  ;;  %v1342_v32 = vmul.f32 %v3376_v19, %v3491_v59  ;;  %v1341_v59 = vmul.f32 %v3376_v19, %v3540_v30 }
 0x260   :  { %1584 = vmatpush.msrb.mxu0 %v2320_v56  ;;  %1944 = vperm.xlu2 %2179, %v1665_v29   ;;  %2331 = vtanh.f32 %v1515_v14  ;;  %v1538_v29 = vadd.f32 %v3681_v45, %v1346_v4  ;;  %v1343_v56 = vmul.f32 %v3376_v19, %v3559_v49  ;;  %v1660_v49 = vld [vmem:[%s3987_s3 + $0x340] sm:$0xff] }
 0x261   :  { %1827 = vperm.xlu1 %2178, %v1648_v22   ;;  %2029 = vperm.xlu0 %2177, %v1682_v21   ;;  %2333 = vtanh.f32 %v3555_v25  ;;  %v1656_v4 = vld [vmem:[%s3987_s3 + $0x320] sm:$0xff] }
 0x262   :  { %1585 = vmatpush.msrb.mxu0 %v2322_v18  ;;  %v3727_v44 = vpop.permute.xlu2 %1697  ;;  %2335 = vtanh.f32 %v1513_v9  ;;  %v1535_v17 = vadd.f32 %v3664_v3, %v1343_v56 }
 0x263   :  { %v2326_v40 = vpop.eup %2325  ;;  %v3732_v47 = vpop.permute.xlu1 %1472  ;;  %2337 = vtanh.f32 %v1512_v8 }
 0x264   :  { %v3734_v12 = vpop.permute.xlu0 %1467  ;;  %1586 = vmatpush.msrb.mxu0 %v2324_v11  ;;  %1599 = vmatpush.msrb.mxu1 %v2326_v40  ;;  %v2328_v2 = vpop.eup %2327  ;;  %2339 = vtanh.f32 %v3538_v6  ;;  %v1676_v11 = vld [vmem:[%s3987_s3 + $0x3c0] sm:$0xff]  ;;  %v1534_v3 = vadd.f32 %v3732_v47, %v1342_v32 }
 0x265   :  { %v2330_v0 = vpop.eup %2329  ;;  %2341 = vtanh.f32 %v3593_v31  ;;  %v1348_v31 = vmul.f32 %v3376_v19, %v3521_v37  ;;  %v1678_v37 = vld [vmem:[%s3987_s3 + $0x3d0] sm:$0xff]  ;;  %v1652_v32 = vld [vmem:[%s3987_s3 + $0x300] sm:$0xff] }
 0x266   :  { %1587 = vmatpush.msrb.mxu0 %v2328_v2  ;;  %v2332_v25 = vpop.eup %2331  ;;  %v1533_v2 = vadd.f32 %v3734_v12, %v1341_v59 }
 0x267   :  { %v2334_v51 = vpop.eup %2333 }
 0x268   :  { %1588 = vmatpush.msrb.mxu0 %v2330_v0  ;;  %1939 = vperm.xlu2 %2179, %v1664_v13   ;;  %v2336_v61 = vpop.eup %2335  ;;  %v1338_v0 = vmul.f32 %v3376_v19, %v3523_v10 }
 0x269   :  { %1822 = vperm.xlu1 %2178, %v1647_v42   ;;  %2024 = vperm.xlu0 %2177, %v1681_v39   ;;  %v2338_v6 = vpop.eup %2337  ;;  %v1339_v42 = vmul.f32 %v3376_v19, %v3476_v1  ;;  %v1675_v1 = vld [vmem:[%s3987_s3 + $0x3b8] sm:$0xff] }
 0x26a   :  { %1589 = vmatpush.msrb.mxu0 %v2332_v25  ;;  %v3747_v55 = vpop.permute.xlu2 %1712  ;;  %v2340_v26 = vpop.eup %2339  ;;  %v1658_v25 = vld [vmem:[%s3987_s3 + $0x330] sm:$0xff]  ;;  %v1530_v10 = vadd.f32 %v3709_v15, %v1338_v0 }
 0x26b   :  { %v1488_v24 = vpop.permute.xlu1 %1487  ;;  %v2342_v28 = vpop.eup %2341  ;;  %v1531_v12 = vadd.f32 %v3707_v63, %v1339_v42 }
 0x26c   :  { %v1483_v36 = vpop.permute.xlu0 %1482  ;;  %1590 = vmatpush.msrb.mxu0 %v2334_v51  ;;  %v1537_v22 = vadd.f32 %v1488_v24, %v1345_v41  ;;  %v1659_v51 = vld [vmem:[%s3987_s3 + $0x338] sm:$0xff] }
 0x26d   :  { %v1536_v14 = vadd.f32 %v1483_v36, %v1344_v23  ;;  %v1336_v36 = vmul.f32 %v3376_v19, %v3451_v20  ;;  %v1654_v23 = vld [vmem:[%s3987_s3 + $0x310] sm:$0xff] }
 0x26e   :  { %1591 = vmatpush.msrb.mxu0 %v2336_v61 }
 0x270   :  { %1592 = vmatpush.msrb.mxu0 %v2338_v6  ;;  %2014 = vperm.xlu2 %2179, %v1679_v57  }
 0x271   :  { %1934 = vperm.xlu1 %2178, %v1663_v52   ;;  %2019 = vperm.xlu0 %2177, %v1680_v54   ;;  %v1335_v52 = vmul.f32 %v3376_v19, %v3508_v60  ;;  %v1657_v60 = vld [vmem:[%s3987_s3 + $0x328] sm:$0xff] }
 0x272   :  { %1593 = vmatpush.msrb.mxu0 %v2340_v26  ;;  %v3764_v34 = vpop.permute.xlu2 %1727  ;;  %v1673_v26 = vld [vmem:[%s3987_s3 + $0x3a8] sm:$0xff] }
 0x273   :  { %v1503_v35 = vpop.permute.xlu1 %1502  ;;  %v1527_v20 = vadd.f32 %v3687_v53, %v1335_v52 }
 0x274   :  { %v1498_v33 = vpop.permute.xlu0 %1497  ;;  %v1540_v16 = vadd.f32 %v1503_v35, %v1348_v31  ;;  %1594 = vmatpush.msrb.mxu0 %v2342_v28 }
 0x275   :  { %v1539_v43 = vadd.f32 %v1498_v33, %v1347_v7 }
 0x276   :  { %2343 = vtanh.f32 %v1540_v16  ;;  %v1655_v16 = vld [vmem:[%s3987_s3 + $0x318] sm:$0xff] }
 0x277   :  { %2345 = vtanh.f32 %v1539_v43  ;;  %v1672_v43 = vld [vmem:[%s3987_s3 + $0x3a0] sm:$0xff] }
 0x278   :  { %1924 = vperm.xlu2 %2179, %v1661_v46   ;;  %2347 = vtanh.f32 %v1538_v29  ;;  %v1670_v29 = vld [vmem:[%s3987_s3 + $0x390] sm:$0xff] }
 0x279   :  { %2009 = vperm.xlu1 %2178, %v1678_v37   ;;  %1929 = vperm.xlu0 %2177, %v1662_v27   ;;  %2349 = vtanh.f32 %v1537_v22  ;;  %v1671_v22 = vld [vmem:[%s3987_s3 + $0x398] sm:$0xff] }
 0x27a   :  { %v3782_v21 = vpop.permute.xlu2 %1742  ;;  %2351 = vtanh.f32 %v1536_v14 }
 0x27b   :  { %v3786_v18 = vpop.permute.xlu1 %1692  ;;  %2353 = vtanh.f32 %v1535_v17  ;;  %v1669_v17 = vld [vmem:[%s3987_s3 + $0x388] sm:$0xff] }
 0x27c   :  { %v3788_v5 = vpop.permute.xlu0 %1687  ;;  %v2344_v45 = vpop.eup %2343  ;;  %2355 = vtanh.f32 %v1534_v3 }
 0x27d   :  { %1600 = vmatpush.msrb.mxu1 %v2344_v45  ;;  %v2346_v40 = vpop.eup %2345  ;;  %2357 = vtanh.f32 %v1533_v2 }
 0x27e   :  { %v2348_v9 = vpop.eup %2347  ;;  %2359 = vtanh.f32 %v3649_v50  ;;  %v1528_v50 = vadd.f32 %v3685_v48, %v1336_v36  ;;  %v1674_v48 = vld [vmem:[%s3987_s3 + $0x3b0] sm:$0xff] }
 0x27f   :  { %1601 = vmatpush.msrb.mxu1 %v2346_v40  ;;  %v2350_v13 = vpop.eup %2349  ;;  %2361 = vtanh.f32 %v1531_v12 }
 0x280   :  { %1999 = vperm.xlu2 %2179, %v1676_v11   ;;  %v2352_v39 = vpop.eup %2351  ;;  %2363 = vtanh.f32 %v1530_v10  ;;  %v1653_v11 = vld [vmem:[%s3987_s3 + $0x308] sm:$0xff] }
 0x281   :  { %1919 = vperm.xlu1 %2178, %v1660_v49   ;;  %2004 = vperm.xlu0 %2177, %v1677_v38   ;;  %v2354_v24 = vpop.eup %2353  ;;  %2365 = vtanh.f32 %v3636_v58 }
 0x282   :  { %1602 = vmatpush.msrb.mxu1 %v2348_v9  ;;  %v3806_v8 = vpop.permute.xlu2 %1757  ;;  %v2356_v63 = vpop.eup %2355  ;;  %2367 = vtanh.f32 %v1528_v50  ;;  %v1668_v9 = vld [vmem:[%s3987_s3 + $0x380] sm:$0xff] }
 0x283   :  { %v3810_v30 = vpop.permute.xlu1 %1707  ;;  %v2358_v57 = vpop.eup %2357  ;;  %2369 = vtanh.f32 %v1527_v20  ;;  %v1859_v2 = vmul.f32 %v3376_v19, %v3806_v8  ;;  %v3912_v8 = vld [vmem:[%s3985_s1] ss:$0 sm:$0xff] }
 0x284   :  { %v3812_v47 = vpop.permute.xlu0 %1702  ;;  %1603 = vmatpush.msrb.mxu1 %v2350_v13  ;;  %v2360_v6 = vpop.eup %2359  ;;  %2371 = vtanh.f32 %v3619_v62 }
 0x285   :  { %v2362_v31 = vpop.eup %2361 }
 0x286   :  { %1604 = vmatpush.msrb.mxu1 %v2352_v39  ;;  %v2364_v58 = vpop.eup %2363 }
 0x287   :  { %v2366_v7 = vpop.eup %2365 }
 0x288   :  { %1605 = vmatpush.msrb.mxu1 %v2354_v24  ;;  %1909 = vperm.xlu2 %2179, %v1658_v25   ;;  %v2368_v33 = vpop.eup %2367 }
 0x289   :  { %1994 = vperm.xlu1 %2178, %v1675_v1   ;;  %1914 = vperm.xlu0 %2177, %v1659_v51   ;;  %v2370_v62 = vpop.eup %2369 }
 0x28a   :  { %1606 = vmatpush.msrb.mxu1 %v2356_v63  ;;  %v3830_v61 = vpop.permute.xlu2 %1772  ;;  %v2372_v46 = vpop.eup %2371 }
 0x28b   :  { %v3835_v15 = vpop.permute.xlu1 %1722 }
 0x28c   :  { %v3837_v54 = vpop.permute.xlu0 %1717  ;;  %1607 = vmatpush.msrb.mxu1 %v2358_v57 }
 0x28e   :  { %1608 = vmatpush.msrb.mxu1 %v2360_v6 }
 0x290   :  { %1609 = vmatpush.msrb.mxu1 %v2362_v31  ;;  %1984 = vperm.xlu2 %2179, %v1673_v26  }
 0x291   :  { %1904 = vperm.xlu1 %2178, %v1657_v60   ;;  %1989 = vperm.xlu0 %2177, %v1674_v48  }
 0x292   :  { %1610 = vmatpush.msrb.mxu1 %v2364_v58  ;;  %v3850_v53 = vpop.permute.xlu2 %1787 }
 0x293   :  { %v3853_v28 = vpop.permute.xlu1 %1737 }
 0x294   :  { %v3855_v35 = vpop.permute.xlu0 %1732  ;;  %1611 = vmatpush.msrb.mxu1 %v2366_v7 }
 0x296   :  { %1612 = vmatpush.msrb.mxu1 %v2368_v33 }
 0x298   :  { %1613 = vmatpush.msrb.mxu1 %v2370_v62  ;;  %1894 = vperm.xlu2 %2179, %v1655_v16  }
 0x299   :  { %1979 = vperm.xlu1 %2178, %v1672_v43   ;;  %1899 = vperm.xlu0 %2177, %v1656_v4  }
 0x29a   :  { %1614 = vmatpush.msrb.mxu1 %v2372_v46  ;;  %v3866_v37 = vpop.permute.xlu2 %1802 }
 0x29b   :  { %v1753_v27 = vpop.permute.xlu1 %1752 }
 0x29c   :  { %v1748_v41 = vpop.permute.xlu0 %1747  ;;  %v1858_v25 = vmul.f32 %v3376_v19, %v1753_v27 }
 0x29d   :  { %v1857_v36 = vmul.f32 %v3912_v8, %v1748_v41 }
 0x2a0   :  { %1969 = vperm.xlu2 %2179, %v1670_v29  }
 0x2a1   :  { %1889 = vperm.xlu1 %2178, %v1654_v23   ;;  %1974 = vperm.xlu0 %2177, %v1671_v22  }
 0x2a2   :  { %v3877_v56 = vpop.permute.xlu2 %1817 }
 0x2a3   :  { %v3879_v14 = vpop.permute.xlu1 %1767 }
 0x2a4   :  { %v1763_v45 = vpop.permute.xlu0 %1762 }
 0x2a5   :  { %v1860_v40 = vmul.f32 %v3376_v19, %v1763_v45  ;;  %v1856_v45 = vmul.f32 %v3912_v8, %v3782_v21  ;;  %v1854_v21 = vmul.f32 %v3912_v8, %v3855_v35 }
 0x2a8   :  { %1879 = vperm.xlu2 %2179, %v1652_v32  }
 0x2a9   :  { %1964 = vperm.xlu1 %2178, %v1669_v17   ;;  %1884 = vperm.xlu0 %2177, %v1653_v11  }
 0x2aa   :  { %v1955_v49 = vpop.permute.xlu2 %1954 }
 0x2ab   :  { %v2052_v38 = vadd.f32 %v1955_v49, %v1860_v40  ;;  %v3891_v59 = vpop.permute.xlu1 %1782 }
 0x2ac   :  { %v3893_v3 = vpop.permute.xlu0 %1777 }
 0x2ad   :  { %2373 = vtanh.f32 %v2052_v38 }
 0x2b1   :  { %1959 = vperm.xlu0 %2177, %v1668_v9  }
 0x2b2   :  { %v1950_v13 = vpop.permute.xlu2 %1949 }
 0x2b3   :  { %v2374_v42 = vpop.eup %2373  ;;  %v2051_v39 = vadd.f32 %v1950_v13, %v1859_v2  ;;  %v3900_v0 = vpop.permute.xlu1 %1797  ;;  %v1855_v13 = vmul.f32 %v3912_v8, %v3853_v28  ;;  %v1853_v28 = vmul.f32 %v3912_v8, %v3764_v34  ;;  %v1852_v34 = vmul.f32 %v3912_v8, %v3835_v15 }
 0x2b4   :  { %v3902_v12 = vpop.permute.xlu0 %1792  ;;  %2106 = vmatpush.msrb.mxu2 %v2374_v42  ;;  %v1871_v42 = vmul.f32 %v3912_v8, %v3877_v56  ;;  %v1850_v15 = vmul.f32 %v3912_v8, %v3747_v55 }
 0x2b5   :  { %2375 = vtanh.f32 %v2051_v39 }
 0x2ba   :  { %v1945_v1 = vpop.permute.xlu2 %1944 }
 0x2bb   :  { %v2376_v51 = vpop.eup %2375  ;;  %v2050_v24 = vadd.f32 %v1945_v1, %v1858_v25  ;;  %v3905_v10 = vpop.permute.xlu1 %1812 }
 0x2bc   :  { %v3907_v63 = vpop.permute.xlu0 %1807  ;;  %2107 = vmatpush.msrb.mxu2 %v2376_v51  ;;  %v1870_v35 = vmul.f32 %v3912_v8, %v3905_v10  ;;  %v1868_v10 = vmul.f32 %v3912_v8, %v3866_v37  ;;  %v586_v37 = vld [vmem:[%s3988_s4 + $0x2] sm:$0x3] }
 0x2bd   :  { %2377 = vtanh.f32 %v2050_v24 }
 0x2c2   :  { %v1940_v57 = vpop.permute.xlu2 %1939 }
 0x2c3   :  { %v2378_v52 = vpop.eup %2377  ;;  %v2049_v50 = vadd.f32 %v1940_v57, %v1857_v36  ;;  %v1838_v19 = vpop.permute.xlu1 %1837 }
 0x2c4   :  { %v1843_v6 = vpop.permute.xlu0 %1842  ;;  %2108 = vmatpush.msrb.mxu2 %v2378_v52  ;;  %v1875_v58 = vmul.f32 %v3912_v8, %v1838_v19 }
 0x2c5   :  { %2379 = vtanh.f32 %v2049_v50  ;;  %v1876_v20 = vmul.f32 %v3912_v8, %v1843_v6  ;;  %v1869_v50 = vmul.f32 %v3912_v8, %v3907_v63  ;;  %v1851_v63 = vmul.f32 %v3912_v8, %v3837_v54 }
 0x2c6   :  { %v1867_v54 = vmul.f32 %v3912_v8, %v3900_v0 }
 0x2ca   :  { %v2015_v43 = vpop.permute.xlu2 %2014 }
 0x2cb   :  { %v2380_v26 = vpop.eup %2379  ;;  %v1833_v60 = vpop.permute.xlu1 %1832 }
 0x2cc   :  { %v2035_v48 = vpop.permute.xlu0 %2034  ;;  %2109 = vmatpush.msrb.mxu2 %v2380_v26  ;;  %v1874_v62 = vmul.f32 %v3912_v8, %v1833_v60 }
 0x2cd   :  { %v2068_v31 = vadd.f32 %v2035_v48, %v1876_v20 }
 0x2cf   :  { %2381 = vtanh.f32 %v2068_v31 }
 0x2d2   :  { %v1925_v23 = vpop.permute.xlu2 %1924 }
 0x2d3   :  { %v1828_v7 = vpop.permute.xlu1 %1827  ;;  %v2046_v57 = vadd.f32 %v1925_v23, %v1854_v21  ;;  %v1866_v23 = vmul.f32 %v3912_v8, %v3902_v12  ;;  %v1157_v12 = vld [vmem:[%s3988_s4 + $0x4] sm:$0x3]  ;;  %v1849_v21 = vmul.f32 %v3912_v8, %v3810_v30 }
 0x2d4   :  { %v2030_v33 = vpop.permute.xlu0 %2029  ;;  %v1873_v32 = vmul.f32 %v3912_v8, %v1828_v7 }
 0x2d5   :  { %v2382_v16 = vpop.eup %2381  ;;  %v2067_v4 = vadd.f32 %v2030_v33, %v1875_v58 }
 0x2d6   :  { %2126 = vmatpush.msrb.mxu3 %v2382_v16 }
 0x2d7   :  { %2383 = vtanh.f32 %v2067_v4 }
 0x2da   :  { %v2000_v2 = vpop.permute.xlu2 %1999 }
 0x2db   :  { %v1823_v46 = vpop.permute.xlu1 %1822  ;;  %v2061_v31 = vadd.f32 %v2000_v2, %v1869_v50  ;;  %v1863_v50 = vmul.f32 %v3912_v8, %v3893_v3 }
 0x2dc   :  { %v2025_v27 = vpop.permute.xlu0 %2024  ;;  %v1872_v22 = vmul.f32 %v3912_v8, %v1823_v46 }
 0x2dd   :  { %v2384_v41 = vpop.eup %2383  ;;  %v2066_v29 = vadd.f32 %v2025_v27, %v1874_v62 }
 0x2de   :  { %2127 = vmatpush.msrb.mxu3 %v2384_v41  ;;  %v2064_v9 = vadd.f32 %v2015_v43, %v1872_v22 }
 0x2df   :  { %2385 = vtanh.f32 %v2066_v29  ;;  %v102_v29 = vld [vmem:[%s3988_s4] sm:$0x3] }
 0x2e2   :  { %v1910_v56 = vpop.permute.xlu2 %1909 }
 0x2e3   :  { %v1935_v17 = vpop.permute.xlu1 %1934  ;;  %v2043_v27 = vadd.f32 %v1910_v56, %v1851_v63 }
 0x2e4   :  { %v2020_v11 = vpop.permute.xlu0 %2019  ;;  %v2048_v49 = vadd.f32 %v1935_v17, %v1856_v45  ;;  %v1005_v17 = vperm.slane %v586_v37, 1 }
 0x2e5   :  { %v2386_v40 = vpop.eup %2385  ;;  %v2065_v38 = vadd.f32 %v2020_v11, %v1873_v32  ;;  %v1004_v32 = vperm.slane %v586_v37, 0  ;;  %v1049_v11 = vperm.slane %v102_v29, 0 }
 0x2e6   :  { %2128 = vmatpush.msrb.mxu3 %v2386_v40  ;;  %2387 = vtanh.f32 %v2048_v49  ;;  %1044 = vmatmul.f32.vlgmr.msra.gmra.mxu1 %v1005_v17 }
 0x2e7   :  { %2389 = vtanh.f32 %v2065_v38  ;;  %1024 = vmatmul.f32.vlgmr.msra.gmra.mxu0 %v1004_v32  ;;  %1069 = vmatmul.f32.vlgmr.msra.gmra.mxu2 %v1049_v11 }
 0x2e8   :  { %2391 = vtanh.f32 %v2064_v9  ;;  %v1050_v9 = vperm.slane %v102_v29, 1 }
 0x2ea   :  { %v1985_v43 = vpop.permute.xlu2 %1984  ;;  %1089 = vmatmul.f32.vlgmr.msra.gmra.mxu3 %v1050_v9 }
 0x2eb   :  { %v2010_v39 = vpop.permute.xlu1 %2009  ;;  %v2058_v38 = vadd.f32 %v1985_v43, %v1866_v23 }
 0x2ec   :  { %v1930_v25 = vpop.permute.xlu0 %1929  ;;  %v2388_v1 = vpop.eup %2387  ;;  %v2063_v51 = vadd.f32 %v2010_v39, %v1871_v42  ;;  %v1575_v42 = vperm.slane %v1157_v12, 0  ;;  %v1865_v39 = vmul.f32 %v3912_v8, %v3850_v53  ;;  %v1864_v53 = vmul.f32 %v3912_v8, %v3891_v59 }
 0x2ed   :  { %v2047_v24 = vadd.f32 %v1930_v25, %v1855_v13  ;;  %v2390_v36 = vpop.eup %2389  ;;  %2110 = vmatpush.msrb.mxu2 %v2388_v1  ;;  %v1576_v25 = vperm.slane %v1157_v12, 1  ;;  %v1848_v1 = vmul.f32 %v3912_v8, %v3812_v47  ;;  %v1847_v47 = vmul.f32 %v3912_v8, %v3727_v44 }
 0x2ee   :  { %2393 = vtanh.f32 %v2063_v51  ;;  %2129 = vmatpush.msrb.mxu3 %v2390_v36  ;;  %v2392_v52 = vpop.eup %2391  ;;  %v1846_v44 = vmul.f32 %v3912_v8, %v3786_v18  ;;  %v1862_v59 = vmul.f32 %v3912_v8, %v3830_v61  ;;  %v1861_v18 = vmul.f32 %v3912_v8, %v3879_v14 }
 0x2ef   :  { %2395 = vtanh.f32 %v2047_v24  ;;  %1595 = vmatmul.f32.vlgmr.msrb.gmra.mxu0 %v1575_v42  ;;  %1615 = vmatmul.f32.vlgmr.msrb.gmra.mxu1 %v1576_v25 }
 0x2f0   :  { %2130 = vmatpush.msrb.mxu3 %v2392_v52  ;;  %2397 = vtanh.f32 %v2046_v57 }
 0x2f2   :  { %v1895_v2 = vpop.permute.xlu2 %1894 }
 0x2f3   :  { %v1920_v19 = vpop.permute.xlu1 %1919 }
 0x2f4   :  { %v2005_v6 = vpop.permute.xlu0 %2004  ;;  %v2394_v20 = vpop.eup %2393  ;;  %v2045_v26 = vadd.f32 %v1920_v19, %v1853_v28 }
 0x2f5   :  { %v2062_v60 = vadd.f32 %v2005_v6, %v1870_v35  ;;  %v2396_v48 = vpop.eup %2395  ;;  %2131 = vmatpush.msrb.mxu3 %v2394_v20  ;;  %v2040_v35 = vadd.f32 %v1895_v2, %v1848_v1 }
 0x2f6   :  { %2399 = vtanh.f32 %v2045_v26  ;;  %2111 = vmatpush.msrb.mxu2 %v2396_v48  ;;  %v2398_v58 = vpop.eup %2397 }
 0x2f7   :  { %2401 = vtanh.f32 %v2062_v60 }
 0x2f8   :  { %2112 = vmatpush.msrb.mxu2 %v2398_v58  ;;  %2403 = vtanh.f32 %v2061_v31 }
 0x2fa   :  { %v1970_v56 = vpop.permute.xlu2 %1969 }
 0x2fb   :  { %v1995_v7 = vpop.permute.xlu1 %1994  ;;  %v2055_v31 = vadd.f32 %v1970_v56, %v1863_v50 }
 0x2fc   :  { %v1915_v33 = vpop.permute.xlu0 %1914  ;;  %v2400_v16 = vpop.eup %2399  ;;  %v2060_v4 = vadd.f32 %v1995_v7, %v1868_v10 }
 0x2fd   :  { %v2044_v62 = vadd.f32 %v1915_v33, %v1852_v34  ;;  %v2402_v46 = vpop.eup %2401  ;;  %2113 = vmatpush.msrb.mxu2 %v2400_v16  ;;  %v1845_v34 = vmul.f32 %v3912_v8, %v3788_v5  ;;  %v1684_v5 = vld [vmem:[%s3988_s4 + $0x6] sm:$0x3]  ;;  %s34_s4 = sld [smem:[#allocation2]] }
 0x2fe   :  { %2405 = vtanh.f32 %v2060_v4  ;;  %2132 = vmatpush.msrb.mxu3 %v2402_v46  ;;  %v2404_v41 = vpop.eup %2403  ;;  %v2103_v37 = vperm.slane %v1684_v5, 1 }
 0x2ff   :  { %2407 = vtanh.f32 %v2044_v62 }
 0x300   :  { %2133 = vmatpush.msrb.mxu3 %v2404_v41  ;;  %2409 = vtanh.f32 %v2043_v27 }
 0x302   :  { %v1880_v3 = vpop.permute.xlu2 %1879 }
 0x303   :  { %v1905_v22 = vpop.permute.xlu1 %1904  ;;  %v2037_v4 = vadd.f32 %v1880_v3, %v1845_v34 }
 0x304   :  { %v1990_v45 = vpop.permute.xlu0 %1989  ;;  %v2406_v55 = vpop.eup %2405  ;;  %v2042_v40 = vadd.f32 %v1905_v22, %v1850_v15  ;;  %v2102_v15 = vperm.slane %v1684_v5, 0 }
 0x305   :  { %v2059_v49 = vadd.f32 %v1990_v45, %v1867_v54  ;;  %v2408_v0 = vpop.eup %2407  ;;  %2134 = vmatpush.msrb.mxu3 %v2406_v55  ;;  %v37_v55 = vld [vmem:[%s3985_s1] sm:$0x1] }
 0x306   :  { %2411 = vtanh.f32 %v2042_v40  ;;  %2114 = vmatpush.msrb.mxu2 %v2408_v0  ;;  %v2410_v13 = vpop.eup %2409  ;;  %v2147_v40 = vstv %s2172_s24 }
 0x307   :  { %2413 = vtanh.f32 %v2059_v49  ;;  %v2148_v9 = vmul.f32 %v2147_v40, %v37_v55 }
 0x308   :  { %2115 = vmatpush.msrb.mxu2 %v2410_v13  ;;  %2415 = vtanh.f32 %v2058_v38  ;;  %v2149_v13 = vstv %s34_s4 }
 0x309   :  { %v2150_v25 = vadd.f32 %v2149_v13, %v2148_v9 }
 0x30b   :  { %v1980_v51 = vpop.permute.xlu1 %1979 }
 0x30c   :  { %v1900_v24 = vpop.permute.xlu0 %1899  ;;  %v2412_v36 = vpop.eup %2411  ;;  %v2057_v57 = vadd.f32 %v1980_v51, %v1865_v39 }
 0x30d   :  { %v2041_v52 = vadd.f32 %v1900_v24, %v1849_v21  ;;  %v2414_v28 = vpop.eup %2413  ;;  %2116 = vmatpush.msrb.mxu2 %v2412_v36  ;;  %v2151_v21 = vstv %s2173_s25 }
 0x30e   :  { %2417 = vtanh.f32 %v2057_v57  ;;  %2135 = vmatpush.msrb.mxu3 %v2414_v28  ;;  %v2416_v30 = vpop.eup %2415 }
 0x30f   :  { %2419 = vtanh.f32 %v2041_v52 }
 0x310   :  { %2136 = vmatpush.msrb.mxu3 %v2416_v30  ;;  %2421 = vtanh.f32 %v2040_v35 }
 0x313   :  { %v1890_v19 = vpop.permute.xlu1 %1889 }
 0x314   :  { %v1975_v6 = vpop.permute.xlu0 %1974  ;;  %v2418_v20 = vpop.eup %2417  ;;  %v2039_v26 = vadd.f32 %v1890_v19, %v1847_v47 }
 0x315   :  { %v2056_v60 = vadd.f32 %v1975_v6, %v1864_v53  ;;  %v2420_v48 = vpop.eup %2419  ;;  %2137 = vmatpush.msrb.mxu3 %v2418_v20 }
 0x316   :  { %2423 = vtanh.f32 %v2039_v26  ;;  %2117 = vmatpush.msrb.mxu2 %v2420_v48  ;;  %v2422_v58 = vpop.eup %2421 }
 0x317   :  { %2425 = vtanh.f32 %v2056_v60 }
 0x318   :  { %2118 = vmatpush.msrb.mxu2 %v2422_v58  ;;  %2427 = vtanh.f32 %v2055_v31 }
 0x31b   :  { %v1965_v10 = vpop.permute.xlu1 %1964 }
 0x31c   :  { %v1885_v63 = vpop.permute.xlu0 %1884  ;;  %v2424_v7 = vpop.eup %2423  ;;  %v2054_v33 = vadd.f32 %v1965_v10, %v1862_v59 }
 0x31d   :  { %v2038_v16 = vadd.f32 %v1885_v63, %v1846_v44  ;;  %v2426_v43 = vpop.eup %2425  ;;  %2119 = vmatpush.msrb.mxu2 %v2424_v7 }
 0x31e   :  { %2429 = vtanh.f32 %v2054_v33  ;;  %2138 = vmatpush.msrb.mxu3 %v2426_v43  ;;  %v2428_v62 = vpop.eup %2427 }
 0x31f   :  { %2431 = vtanh.f32 %v2038_v16 }
 0x320   :  { %2139 = vmatpush.msrb.mxu3 %v2428_v62  ;;  %2433 = vtanh.f32 %v2037_v4 }
 0x324   :  { %v1960_v61 = vpop.permute.xlu0 %1959  ;;  %v2430_v46 = vpop.eup %2429 }
 0x325   :  { %v2053_v27 = vadd.f32 %v1960_v61, %v1861_v18  ;;  %v2432_v41 = vpop.eup %2431  ;;  %2140 = vmatpush.msrb.mxu3 %v2430_v46 }
 0x326   :  { %2120 = vmatpush.msrb.mxu2 %v2432_v41  ;;  %v2434_v54 = vpop.eup %2433 }
 0x327   :  { %2435 = vtanh.f32 %v2053_v27 }
 0x328   :  { %2121 = vmatpush.msrb.mxu2 %v2434_v54 }
 0x329   :  { %2122 = vmatmul.f32.vlgmr.msrb.gmra.mxu2 %v2102_v15 }
 0x32d   :  { %v2436_v29 = vpop.eup %2435 }
 0x32e   :  { %2141 = vmatpush.msrb.mxu3 %v2436_v29 }
 0x32f   :  { %2142 = vmatmul.f32.vlgmr.msrb.gmra.mxu3 %v2103_v37 }
 0x363   :  { %v1045_v8 = vpop.f32.mrf.mxu1 }
 0x364   :  { %v1025_v14 = vpop.f32.mrf.mxu0 }
 0x365   :  { %v1046_v23 = vadd.f32 %v1045_v8, %v1025_v14 }
 0x36a   :  { %v1070_v22 = vpop.f32.mrf.mxu2 }
 0x36b   :  { %v1071_v32 = vadd.f32 %v1070_v22, %v1046_v23 }
 0x36c   :  { %v1596_v17 = vpop.f32.mrf.mxu0  ;;  %v1616_v11 = vpop.f32.mrf.mxu1 }
 0x36d   :  { %v1090_v45 = vpop.f32.mrf.mxu3  ;;  %v1617_v0 = vadd.f32 %v1616_v11, %v1596_v17 }
 0x36e   :  { %v1091_v49 = vadd.f32 %v1090_v45, %v1071_v32 }
 0x370   :  { %v1619_v12 = vadd.f32 %v1617_v0, %v1091_v49 }
 0x3ac   :  { %v2123_v38 = vpop.f32.mrf.mxu2 }
 0x3b2   :  { %v2143_v2 = vpop.f32.mrf.mxu3 }
 0x3b3   :  { %v2144_v42 = vadd.f32 %v2143_v2, %v2123_v38 }
 0x3b5   :  { %v2146_v39 = vadd.f32 %v2144_v42, %v1619_v12 }
 0x3b7   :  { %v2152_v1 = vmul.f32 %v2151_v21, %v2146_v39 }
 0x3b9   :  { %v2153_v51 = vadd.f32 %v2152_v1, %v2150_v25 }
 0x3bb   :  { %2154 = vst [vmem:[#allocation5] sm:$0x1] %v2153_v51 }
 0x3bc   :  { %2165 = dma.vmem_to_hbm [thread:$0]  %s2161_s28, 16, %s2163_s6, [#allocation3]  }
 0x3bd   :  { %2477 = dma.done.wait [#allocation3], 16  }
 0x3be   :  { %2478 = vsyncadd [#allocation3], 4294967280 }
 0x3bf   :  { %2170 = vsyncpa [#allocation3], 1 }
 0x3c0   :  { %2171 = vsyncpa [#allocation4], 1 }

</bundles_post_ra>
